<compile_context>
chip_gen: v6e
topology: v6e:2x2x1
jax: 0.10.0
libtpu: 0.0.40
codegen_flags: <defaults>
</compile_context>

<pallas_src>
import math
import functools

import numpy as np
import jax
import jax.numpy as jnp
from jax.experimental import pallas as pl
from jax.experimental.pallas import tpu as pltpu


def _attention_kernel(x_ref, wq_ref, wk_ref, wv_ref, wo_ref, cs_ref,
                      o_ref, k_cache, v_cache,
                      *, n_heads, n_kv_heads, head_dim, q_tile):
    n_rep = n_heads // n_kv_heads
    hd, hd2, tq = head_dim, head_dim // 2, q_tile
    qi = pl.program_id(1)
    # log2(e) folded into the q scale so the softmax uses exp2 (native EUP op,
    # removes a per-element multiply on the exp critical path - matters on v5e).
    scale = math.log2(math.e) / math.sqrt(hd)
    neg_inf = jnp.float32(-jnp.inf)

    x_t = x_ref[0]                                # (tq, D) bf16, rows [qi*tq, ...)
    cos = cs_ref[:, :hd2]                         # packed (tq, hd) table: [cos|sin]
    sin = cs_ref[:, hd2:]

    def rope(t, n_h, s):
        # rotate-half RoPE (weights pre-permuted so per-head cols are [re...,im...]).
        # The whole rotated tensor is built as ONE value so the write below is a
        # single lane-dense store instead of 2*n_h masked hd/2-wide partial stores.
        parts = []
        for h in range(n_h):
            a = t[:, h * hd:h * hd + hd2]
            b = t[:, h * hd + hd2:(h + 1) * hd]
            parts.append((a * cos - b * sin) * s)
            parts.append((a * sin + b * cos) * s)
        return jnp.concatenate(parts, axis=-1)

    # ---- K / V projection + RoPE(K) for this row tile; append to the VMEM caches.
    #      Earlier rows were cached by earlier (sequential) qi steps of the SAME
    #      batch, which is all causal attention needs -> K/V projected once. ----
    k = jnp.dot(x_t, wk_ref[...], preferred_element_type=jnp.float32)   # (tq, Dkv)
    v = jnp.dot(x_t, wv_ref[...], preferred_element_type=jnp.float32)
    k_bf = rope(k, n_kv_heads, 1.0).astype(jnp.bfloat16)
    v_bf = v.astype(jnp.bfloat16)
    row0 = pl.multiple_of(qi * tq, tq)
    k_cache[pl.ds(row0, tq), :] = k_bf            # one full-width store each
    v_cache[pl.ds(row0, tq), :] = v_bf

    # ---- Q projection + RoPE (scale folded in); kept as a value, no scratch. ----
    q = jnp.dot(x_t, wq_ref[...], preferred_element_type=jnp.float32)   # (tq, D)
    q_bf = rope(q, n_heads, scale).astype(jnp.bfloat16)

    # causal mask for the diagonal tile: built once per grid step, reused by all
    # heads (JAX does not CSE broadcast_in_dim, so hoisting it out matters).
    causal = (jax.lax.broadcasted_iota(jnp.int32, (tq, tq), 1)
              <= jax.lax.broadcasted_iota(jnp.int32, (tq, tq), 0))

    def head_attend(h):
        kvh = h // n_rep                                   # GQA head mapping
        qh = q_bf[:, h * hd:(h + 1) * hd]                  # (tq, hd) bf16
        c0, c1 = kvh * hd, (kvh + 1) * hd

        def update(kh, vh, m, l, acc, masked):
            # NT-form matmul: contract last dims directly, no kh.T relayout.
            s = jax.lax.dot_general(qh, kh, (((1,), (1,)), ((), ())),
                                    preferred_element_type=jnp.float32)  # (tq, tk)
            if masked:
                # NOTE: -inf is safe because every diagonal-tile row has at least
                # one unmasked element; revisit for padded/ragged sequences.
                s = jnp.where(causal, s, neg_inf)
            m_new = jnp.maximum(m, jnp.max(s, axis=-1, keepdims=True))
            alpha = jnp.exp2(m - m_new)
            p = jnp.exp2(s - m_new)
            l_new = alpha * l + jnp.sum(p, axis=-1, keepdims=True)
            pv = jnp.dot(p.astype(jnp.bfloat16), vh,
                         preferred_element_type=jnp.float32)             # (tq, hd)
            return m_new, l_new, alpha * acc + pv

        def interior(j, carry):
            m, l, acc = carry
            kv0 = pl.multiple_of(j * tq, tq)
            kh = k_cache[pl.ds(kv0, tq), c0:c1]
            vh = v_cache[pl.ds(kv0, tq), c0:c1]
            return update(kh, vh, m, l, acc, masked=False)

        # online-softmax state lives in registers (fori carry), not scratch.
        init = (jnp.full((tq, 1), -jnp.inf, jnp.float32),
                jnp.zeros((tq, 1), jnp.float32),
                jnp.zeros((tq, hd), jnp.float32))
        # interior kv tiles (strictly below the diagonal) need no mask; tiles
        # above the diagonal are skipped entirely (~halves the MXU work).
        m, l, acc = jax.lax.fori_loop(0, qi, interior, init)
        # diagonal tile: reuse this step's freshly computed K/V values.
        m, l, acc = update(k_bf[:, c0:c1], v_bf[:, c0:c1], m, l, acc, masked=True)
        inv_l = pl.reciprocal(l, approx=False)             # single EUP op, exact
        return (acc * inv_l).astype(jnp.bfloat16)

    # TODO(synk): for n_heads >= 16, convert this static head loop to a
    # lax.fori_loop (unroll=2-4) with pl.ds head indexing to bound vreg pressure.
    attn = jnp.concatenate([head_attend(h) for h in range(n_heads)], axis=-1)

    out = jnp.dot(attn, wo_ref[...], preferred_element_type=jnp.float32)
    o_ref[0] = out.astype(o_ref.dtype)


def prepare_attention_params(wq_t, wk_t, wv_t, wo_t, freqs_cos, freqs_sin,
                             n_heads, n_kv_heads):
    """One-time preprocessing (model-load time, not per call): rotate-half column
    permutation of Wq/Wk, bf16 casts, and the packed lane-dense [cos|sin] table.
    Weights are stored pre-transposed as (in, out)."""
    D = wq_t.shape[0]
    head_dim = D // n_heads
    hd2 = head_dim // 2
    # Reorder Q/K output features per head from interleaved (re,im,re,im,...) to
    # (re..., im...).  QK^T is invariant to a shared per-head permutation, so
    # V / Wo stay untouched; RoPE becomes two static half slices in-kernel.
    perm = np.arange(head_dim).reshape(hd2, 2).T.reshape(-1)
    cols_q = np.concatenate([h * head_dim + perm for h in range(n_heads)])
    cols_k = np.concatenate([h * head_dim + perm for h in range(n_kv_heads)])
    wq_bf = jnp.asarray(wq_t)[:, cols_q].astype(jnp.bfloat16)
    wk_bf = jnp.asarray(wk_t)[:, cols_k].astype(jnp.bfloat16)
    wv_bf = jnp.asarray(wv_t).astype(jnp.bfloat16)
    wo_bf = jnp.asarray(wo_t).astype(jnp.bfloat16)
    cs = jnp.concatenate([freqs_cos, freqs_sin], axis=-1).astype(jnp.float32)
    return wq_bf, wk_bf, wv_bf, wo_bf, cs


def _vmem_limit_bytes():
    # Derive the limit from the running chip: leave headroom for compiler-internal
    # scratch / semaphores, cap below physical VMEM (64 MiB v7x, 128 MiB v5e/v6e).
    try:
        cap = int(pltpu.get_tpu_info().vmem_capacity_bytes)
    except Exception:
        cap = 64 * 1024 * 1024
    return max(32 * 1024 * 1024, min(cap - 12 * 1024 * 1024, 110 * 1024 * 1024))


def attention_forward(x, params, n_heads, n_kv_heads, q_tile=None):
    """x: (B, S, D) float32.  params: output of prepare_attention_params."""
    wq_bf, wk_bf, wv_bf, wo_bf, cs = params
    B, S, D = x.shape
    assert D % n_heads == 0 and n_heads % n_kv_heads == 0
    head_dim = D // n_heads
    Dkv = n_kv_heads * head_dim

    # 128 is MXU-native on every generation; v6e (128 MiB VMEM) profits from
    # tq=256 when it fits, v5e should stay at 128.
    tq = q_tile if q_tile is not None else min(S, 128)
    assert S % tq == 0 and (tq % 8 == 0 or tq == S)

    x_bf = x.astype(jnp.bfloat16)
    kernel = functools.partial(_attention_kernel, n_heads=n_heads,
                               n_kv_heads=n_kv_heads, head_dim=head_dim,
                               q_tile=tq)

    # Constant-index weight blocks: single-buffered (DMA'd once) -> halves their
    # VMEM residency vs default double buffering.
    const2d = lambda a: pl.BlockSpec(a.shape, lambda b, q: (0, 0),
                                     pipeline_mode=pl.Buffered(1))
    # TODO(synk): for D >= ~2048 tile Wq/Wo (and Wk/Wv) over output columns
    # (extra grid axis or pltpu.emit_pipeline) instead of keeping them fully
    # resident in VMEM.
    # TODO(synk): for long context, move k_cache/v_cache to HBM (pl.ANY) and
    # stream tk-row chunks via make_async_copy inside the interior loop.
    # TODO(synk): on v7x, decouple the kv chunk size (tk=256-512) from tq and add
    # a second parallel axis (kv-head groups) so both TensorCores are busy at B=1.

    return pl.pallas_call(
        kernel,
        out_shape=jax.ShapeDtypeStruct((B, S, D), jnp.float32),
        grid=(B, S // tq),
        in_specs=[
            pl.BlockSpec((1, tq, D), lambda b, q: (b, q, 0)),     # x row tile
            const2d(wq_bf), const2d(wk_bf), const2d(wv_bf), const2d(wo_bf),
            pl.BlockSpec((tq, head_dim), lambda b, q: (q, 0)),    # packed cos|sin rows
        ],
        out_specs=pl.BlockSpec((1, tq, D), lambda b, q: (b, q, 0)),
        scratch_shapes=[
            pltpu.VMEM((S, Dkv), jnp.bfloat16),   # K cache (RoPE'd), filled per qi step
            pltpu.VMEM((S, Dkv), jnp.bfloat16),   # V cache
        ],
        compiler_params=pltpu.CompilerParams(
            dimension_semantics=("parallel", "arbitrary"),
            vmem_limit_bytes=_vmem_limit_bytes()),
    )(x_bf, wq_bf, wk_bf, wv_bf, wo_bf, cs)


def reference_forward(x, wq_t, wk_t, wv_t, wo_t, freqs_cos, freqs_sin,
                      n_heads, n_kv_heads):
    """Pure-JAX (f32) mirror of the PyTorch Attention.forward (qk_norm=False)."""
    B, S, D = x.shape
    head_dim = D // n_heads
    n_rep = n_heads // n_kv_heads
    q = (x @ wq_t).reshape(B, S, n_heads, head_dim)
    k = (x @ wk_t).reshape(B, S, n_kv_heads, head_dim)
    v = (x @ wv_t).reshape(B, S, n_kv_heads, head_dim)

    def rope(t):
        tr = t.reshape(*t.shape[:-1], head_dim // 2, 2)
        a, b = tr[..., 0], tr[..., 1]
        c = freqs_cos[None, :, None, :]
        s = freqs_sin[None, :, None, :]
        return jnp.stack([a * c - b * s, a * s + b * c], axis=-1).reshape(t.shape)

    q, k = rope(q), rope(k)
    k = jnp.repeat(k, n_rep, axis=2)
    v = jnp.repeat(v, n_rep, axis=2)
    q, k, v = (t.transpose(0, 2, 1, 3) for t in (q, k, v))
    scores = jnp.einsum('bhqd,bhkd->bhqk', q, k) / math.sqrt(head_dim)
    mask = jnp.tril(jnp.ones((S, S), bool))
    scores = jnp.where(mask[None, None], scores, -jnp.inf)
    p = jax.nn.softmax(scores, axis=-1)
    out = jnp.einsum('bhqk,bhkd->bhqd', p, v)
    out = out.transpose(0, 2, 1, 3).reshape(B, S, D)
    return out @ wo_t


if __name__ == "__main__":
    # small config: dim=32, n_heads=4, n_kv_heads=2 (GQA n_rep=2), seq=16, batch=2.
    # q_tile=8 -> grid (2, 2): exercises the multi-tile flash path (interior kv
    # tile + masked diagonal tile + K/V cache carry across q tiles).
    B, S, D = 2, 16, 32
    n_heads, n_kv_heads = 4, 2
    head_dim = D // n_heads
    Dkv = n_kv_heads * head_dim

    key = jax.random.PRNGKey(0)
    kx, kq, kk, kv, ko = jax.random.split(key, 5)
    x = jax.random.normal(kx, (B, S, D), jnp.float32)
    # weights stored pre-transposed: (in, out)  (nn.Linear: y = x @ W.T)
    wq_t = jax.random.normal(kq, (D, D), jnp.float32) * 0.05
    wk_t = jax.random.normal(kk, (D, Dkv), jnp.float32) * 0.05
    wv_t = jax.random.normal(kv, (D, Dkv), jnp.float32) * 0.05
    wo_t = jax.random.normal(ko, (D, D), jnp.float32) * 0.05

    # freqs_cis (Llama convention, theta=10000), stored as cos/sin tables
    theta = 10000.0
    inv_freq = 1.0 / (theta ** (np.arange(0, head_dim, 2, dtype=np.float32) / head_dim))
    t = np.arange(S, dtype=np.float32)
    angles = jnp.asarray(np.outer(t, inv_freq))          # (S, hd//2)
    freqs_cos, freqs_sin = jnp.cos(angles), jnp.sin(angles)

    params = prepare_attention_params(wq_t, wk_t, wv_t, wo_t,
                                      freqs_cos, freqs_sin, n_heads, n_kv_heads)
    out = attention_forward(x, params, n_heads, n_kv_heads, q_tile=8)
    out = jax.block_until_ready(out)

    ref = reference_forward(x, wq_t, wk_t, wv_t, wo_t, freqs_cos, freqs_sin,
                            n_heads, n_kv_heads)
    # bf16 MXU operands (Q/K/V/P quantized) dominate the error budget.
    np.testing.assert_allclose(np.asarray(out), np.asarray(ref),
                               rtol=2e-2, atol=2e-2)
    print("KERNEL_OK")
</pallas_src>

<mosaic_0001>
module attributes {stable_mosaic.version = 11 : i64} {
  func.func @_attention_kernel(%arg0: i32, %arg1: i32, %arg2: memref<1x8x32xbf16, #tpu.memory_space<vmem>>, %arg3: memref<32x32xbf16, #tpu.memory_space<vmem>>, %arg4: memref<32x16xbf16, #tpu.memory_space<vmem>>, %arg5: memref<32x16xbf16, #tpu.memory_space<vmem>>, %arg6: memref<32x32xbf16, #tpu.memory_space<vmem>>, %arg7: memref<8x8xf32, #tpu.memory_space<vmem>>, %arg8: memref<1x8x32xf32, #tpu.memory_space<vmem>>, %arg9: memref<16x16xbf16, #tpu.memory_space<vmem>>, %arg10: memref<16x16xbf16, #tpu.memory_space<vmem>>) attributes {dimension_semantics = [#tpu.dimension_semantics<parallel>, #tpu.dimension_semantics<arbitrary>], iteration_bounds = array<i64: 2, 2>, scalar_prefetch = 0 : i64, scratch_operands = 2 : i64, tpu.core_type = #tpu.core_type<tc>, window_params = [{transform_indices = @transform_0, window_bounds = array<i64: 1, 8, 32>}, {pipeline_mode = #tpu.pipeline_mode<synchronous>, transform_indices = @transform_1, window_bounds = array<i64: 32, 32>}, {pipeline_mode = #tpu.pipeline_mode<synchronous>, transform_indices = @transform_2, window_bounds = array<i64: 32, 16>}, {pipeline_mode = #tpu.pipeline_mode<synchronous>, transform_indices = @transform_3, window_bounds = array<i64: 32, 16>}, {pipeline_mode = #tpu.pipeline_mode<synchronous>, transform_indices = @transform_4, window_bounds = array<i64: 32, 32>}, {transform_indices = @transform_5, window_bounds = array<i64: 8, 8>}, {transform_indices = @transform_6, window_bounds = array<i64: 1, 8, 32>}]} {
    %c0 = arith.constant 0 : index
    %c0_0 = arith.constant 0 : index
    %c0_1 = arith.constant 0 : index
    %0 = vector.load %arg2[%c0, %c0_0, %c0_1] : memref<1x8x32xbf16, #tpu.memory_space<vmem>>, vector<1x8x32xbf16>
    %1 = vector.shape_cast %0 : vector<1x8x32xbf16> to vector<8x32xbf16>
    %c0_2 = arith.constant 0 : index
    %c0_3 = arith.constant 0 : index
    %2 = vector.load %arg7[%c0_2, %c0_3] : memref<8x8xf32, #tpu.memory_space<vmem>>, vector<8x4xf32>
    %c0_4 = arith.constant 0 : index
    %c4 = arith.constant 4 : index
    %3 = vector.load %arg7[%c0_4, %c4] : memref<8x8xf32, #tpu.memory_space<vmem>>, vector<8x4xf32>
    %c0_5 = arith.constant 0 : index
    %c0_6 = arith.constant 0 : index
    %4 = vector.load %arg4[%c0_5, %c0_6] : memref<32x16xbf16, #tpu.memory_space<vmem>>, vector<32x16xbf16>
    %cst = arith.constant dense<0.000000e+00> : vector<8x16xf32>
    %5 = tpu.matmul %1, %4, %cst {dimension_numbers = #tpu.dot_dimension_numbers<[1], [0], [0], [1], [0, 0, 1, 1], [], []>} : vector<8x32xbf16>, vector<32x16xbf16>, vector<8x16xf32> -> vector<8x16xf32>
    %c0_7 = arith.constant 0 : index
    %c0_8 = arith.constant 0 : index
    %6 = vector.load %arg5[%c0_7, %c0_8] : memref<32x16xbf16, #tpu.memory_space<vmem>>, vector<32x16xbf16>
    %cst_9 = arith.constant dense<0.000000e+00> : vector<8x16xf32>
    %7 = tpu.matmul %1, %6, %cst_9 {dimension_numbers = #tpu.dot_dimension_numbers<[1], [0], [0], [1], [0, 0, 1, 1], [], []>} : vector<8x32xbf16>, vector<32x16xbf16>, vector<8x16xf32> -> vector<8x16xf32>
    %8 = vector.extract_strided_slice %5 {offsets = [0, 0], sizes = [8, 4], strides = [1, 1]} : vector<8x16xf32> to vector<8x4xf32>
    %9 = vector.extract_strided_slice %5 {offsets = [0, 4], sizes = [8, 4], strides = [1, 1]} : vector<8x16xf32> to vector<8x4xf32>
    %10 = arith.mulf %8, %2 : vector<8x4xf32>
    %11 = arith.mulf %9, %3 : vector<8x4xf32>
    %12 = arith.subf %10, %11 : vector<8x4xf32>
    %cst_10 = arith.constant 1.000000e+00 : f32
    %13 = vector.broadcast %cst_10 : f32 to vector<8x4xf32>
    %14 = arith.mulf %12, %13 : vector<8x4xf32>
    %15 = arith.mulf %8, %3 : vector<8x4xf32>
    %16 = arith.mulf %9, %2 : vector<8x4xf32>
    %17 = arith.addf %15, %16 : vector<8x4xf32>
    %cst_11 = arith.constant 1.000000e+00 : f32
    %18 = vector.broadcast %cst_11 : f32 to vector<8x4xf32>
    %19 = arith.mulf %17, %18 : vector<8x4xf32>
    %20 = vector.extract_strided_slice %5 {offsets = [0, 8], sizes = [8, 4], strides = [1, 1]} : vector<8x16xf32> to vector<8x4xf32>
    %21 = vector.extract_strided_slice %5 {offsets = [0, 12], sizes = [8, 4], strides = [1, 1]} : vector<8x16xf32> to vector<8x4xf32>
    %22 = arith.mulf %20, %2 : vector<8x4xf32>
    %23 = arith.mulf %21, %3 : vector<8x4xf32>
    %24 = arith.subf %22, %23 : vector<8x4xf32>
    %cst_12 = arith.constant 1.000000e+00 : f32
    %25 = vector.broadcast %cst_12 : f32 to vector<8x4xf32>
    %26 = arith.mulf %24, %25 : vector<8x4xf32>
    %27 = arith.mulf %20, %3 : vector<8x4xf32>
    %28 = arith.mulf %21, %2 : vector<8x4xf32>
    %29 = arith.addf %27, %28 : vector<8x4xf32>
    %cst_13 = arith.constant 1.000000e+00 : f32
    %30 = vector.broadcast %cst_13 : f32 to vector<8x4xf32>
    %31 = arith.mulf %29, %30 : vector<8x4xf32>
    %32 = tpu.concatenate %14, %19, %26, %31 in 1 : vector<8x4xf32>, vector<8x4xf32>, vector<8x4xf32>, vector<8x4xf32> -> vector<8x16xf32>
    %33 = arith.truncf %32 : vector<8x16xf32> to vector<8x16xbf16>
    %34 = arith.truncf %7 : vector<8x16xf32> to vector<8x16xbf16>
    %c8_i32 = arith.constant 8 : i32
    %35 = arith.muli %arg1, %c8_i32 : i32
    %36 = tpu.assume_multiple %35, 8 : i32
    %37 = arith.index_cast %36 : i32 to index
    %c0_14 = arith.constant 0 : index
    %38 = vector.load %arg9[%37, %c0_14] : memref<16x16xbf16, #tpu.memory_space<vmem>>, vector<8x16xbf16>
    tpu.vector_store %arg9[%37, %c0_14], %33 {strides = array<i32>} : memref<16x16xbf16, #tpu.memory_space<vmem>>, vector<8x16xbf16>,
    %39 = arith.index_cast %36 : i32 to index
    %c0_15 = arith.constant 0 : index
    %40 = vector.load %arg10[%39, %c0_15] : memref<16x16xbf16, #tpu.memory_space<vmem>>, vector<8x16xbf16>
    tpu.vector_store %arg10[%39, %c0_15], %34 {strides = array<i32>} : memref<16x16xbf16, #tpu.memory_space<vmem>>, vector<8x16xbf16>,
    %c0_16 = arith.constant 0 : index
    %c0_17 = arith.constant 0 : index
    %41 = vector.load %arg3[%c0_16, %c0_17] : memref<32x32xbf16, #tpu.memory_space<vmem>>, vector<32x32xbf16>
    %cst_18 = arith.constant dense<0.000000e+00> : vector<8x32xf32>
    %42 = tpu.matmul %1, %41, %cst_18 {dimension_numbers = #tpu.dot_dimension_numbers<[1], [0], [0], [1], [0, 0, 1, 1], [], []>} : vector<8x32xbf16>, vector<32x32xbf16>, vector<8x32xf32> -> vector<8x32xf32>
    %43 = vector.extract_strided_slice %42 {offsets = [0, 0], sizes = [8, 4], strides = [1, 1]} : vector<8x32xf32> to vector<8x4xf32>
    %44 = vector.extract_strided_slice %42 {offsets = [0, 4], sizes = [8, 4], strides = [1, 1]} : vector<8x32xf32> to vector<8x4xf32>
    %45 = arith.mulf %43, %2 : vector<8x4xf32>
    %46 = arith.mulf %44, %3 : vector<8x4xf32>
    %47 = arith.subf %45, %46 : vector<8x4xf32>
    %cst_19 = arith.constant 0.510069728 : f32
    %48 = vector.broadcast %cst_19 : f32 to vector<8x4xf32>
    %49 = arith.mulf %47, %48 : vector<8x4xf32>
    %50 = arith.mulf %43, %3 : vector<8x4xf32>
    %51 = arith.mulf %44, %2 : vector<8x4xf32>
    %52 = arith.addf %50, %51 : vector<8x4xf32>
    %cst_20 = arith.constant 0.510069728 : f32
    %53 = vector.broadcast %cst_20 : f32 to vector<8x4xf32>
    %54 = arith.mulf %52, %53 : vector<8x4xf32>
    %55 = vector.extract_strided_slice %42 {offsets = [0, 8], sizes = [8, 4], strides = [1, 1]} : vector<8x32xf32> to vector<8x4xf32>
    %56 = vector.extract_strided_slice %42 {offsets = [0, 12], sizes = [8, 4], strides = [1, 1]} : vector<8x32xf32> to vector<8x4xf32>
    %57 = arith.mulf %55, %2 : vector<8x4xf32>
    %58 = arith.mulf %56, %3 : vector<8x4xf32>
    %59 = arith.subf %57, %58 : vector<8x4xf32>
    %cst_21 = arith.constant 0.510069728 : f32
    %60 = vector.broadcast %cst_21 : f32 to vector<8x4xf32>
    %61 = arith.mulf %59, %60 : vector<8x4xf32>
    %62 = arith.mulf %55, %3 : vector<8x4xf32>
    %63 = arith.mulf %56, %2 : vector<8x4xf32>
    %64 = arith.addf %62, %63 : vector<8x4xf32>
    %cst_22 = arith.constant 0.510069728 : f32
    %65 = vector.broadcast %cst_22 : f32 to vector<8x4xf32>
    %66 = arith.mulf %64, %65 : vector<8x4xf32>
    %67 = vector.extract_strided_slice %42 {offsets = [0, 16], sizes = [8, 4], strides = [1, 1]} : vector<8x32xf32> to vector<8x4xf32>
    %68 = vector.extract_strided_slice %42 {offsets = [0, 20], sizes = [8, 4], strides = [1, 1]} : vector<8x32xf32> to vector<8x4xf32>
    %69 = arith.mulf %67, %2 : vector<8x4xf32>
    %70 = arith.mulf %68, %3 : vector<8x4xf32>
    %71 = arith.subf %69, %70 : vector<8x4xf32>
    %cst_23 = arith.constant 0.510069728 : f32
    %72 = vector.broadcast %cst_23 : f32 to vector<8x4xf32>
    %73 = arith.mulf %71, %72 : vector<8x4xf32>
    %74 = arith.mulf %67, %3 : vector<8x4xf32>
    %75 = arith.mulf %68, %2 : vector<8x4xf32>
    %76 = arith.addf %74, %75 : vector<8x4xf32>
    %cst_24 = arith.constant 0.510069728 : f32
    %77 = vector.broadcast %cst_24 : f32 to vector<8x4xf32>
    %78 = arith.mulf %76, %77 : vector<8x4xf32>
    %79 = vector.extract_strided_slice %42 {offsets = [0, 24], sizes = [8, 4], strides = [1, 1]} : vector<8x32xf32> to vector<8x4xf32>
    %80 = vector.extract_strided_slice %42 {offsets = [0, 28], sizes = [8, 4], strides = [1, 1]} : vector<8x32xf32> to vector<8x4xf32>
    %81 = arith.mulf %79, %2 : vector<8x4xf32>
    %82 = arith.mulf %80, %3 : vector<8x4xf32>
    %83 = arith.subf %81, %82 : vector<8x4xf32>
    %cst_25 = arith.constant 0.510069728 : f32
    %84 = vector.broadcast %cst_25 : f32 to vector<8x4xf32>
    %85 = arith.mulf %83, %84 : vector<8x4xf32>
    %86 = arith.mulf %79, %3 : vector<8x4xf32>
    %87 = arith.mulf %80, %2 : vector<8x4xf32>
    %88 = arith.addf %86, %87 : vector<8x4xf32>
    %cst_26 = arith.constant 0.510069728 : f32
    %89 = vector.broadcast %cst_26 : f32 to vector<8x4xf32>
    %90 = arith.mulf %88, %89 : vector<8x4xf32>
    %91 = tpu.concatenate %49, %54, %61, %66, %73, %78, %85, %90 in 1 : vector<8x4xf32>, vector<8x4xf32>, vector<8x4xf32>, vector<8x4xf32>, vector<8x4xf32>, vector<8x4xf32>, vector<8x4xf32>, vector<8x4xf32> -> vector<8x32xf32>
    %92 = arith.truncf %91 : vector<8x32xf32> to vector<8x32xbf16>
    %93 = tpu.iota {dimensions = array<i32: 1>} : vector<8x8xi32>
    %94 = tpu.iota {dimensions = array<i32: 0>} : vector<8x8xi32>
    %95 = arith.cmpi sle, %93, %94 : vector<8x8xi32>
    %96 = vector.extract_strided_slice %92 {offsets = [0, 0], sizes = [8, 8], strides = [1, 1]} : vector<8x32xbf16> to vector<8x8xbf16>
    %cst_27 = arith.constant 0xFF800000 : f32
    %97 = vector.broadcast %cst_27 : f32 to vector<8x1xf32>
    %cst_28 = arith.constant 0.000000e+00 : f32
    %98 = vector.broadcast %cst_28 : f32 to vector<8x1xf32>
    %cst_29 = arith.constant 0.000000e+00 : f32
    %99 = vector.broadcast %cst_29 : f32 to vector<8x8xf32>
    %c0_i32 = arith.constant 0 : i32
    %100 = arith.subi %arg1, %c0_i32 : i32
    %101 = arith.addi %c0_i32, %100 : i32
    %c1_i32 = arith.constant 1 : i32
    %102:3 = scf.for %arg11 = %c0_i32 to %101 step %c1_i32 iter_args(%arg12 = %97, %arg13 = %98, %arg14 = %99) -> (vector<8x1xf32>, vector<8x1xf32>, vector<8x8xf32>)  : i32 {
      %c8_i32_71 = arith.constant 8 : i32
      %234 = arith.muli %arg11, %c8_i32_71 : i32
      %235 = tpu.assume_multiple %234, 8 : i32
      %236 = arith.index_cast %235 : i32 to index
      %c0_72 = arith.constant 0 : index
      %237 = vector.load %arg9[%236, %c0_72] : memref<16x16xbf16, #tpu.memory_space<vmem>>, vector<8x8xbf16>
      %238 = arith.index_cast %235 : i32 to index
      %c0_73 = arith.constant 0 : index
      %239 = vector.load %arg10[%238, %c0_73] : memref<16x16xbf16, #tpu.memory_space<vmem>>, vector<8x8xbf16>
      %cst_74 = arith.constant dense<0.000000e+00> : vector<8x8xf32>
      %240 = tpu.matmul %96, %237, %cst_74 {dimension_numbers = #tpu.dot_dimension_numbers<[1], [1], [0], [0], [0, 0, 1, 0], [], []>} : vector<8x8xbf16>, vector<8x8xbf16>, vector<8x8xf32> -> vector<8x8xf32>
      %cst_75 = arith.constant dense<0xFF800000> : vector<8xf32>
      %241 = vector.multi_reduction <maximumf>, %240, %cst_75 [1] : vector<8x8xf32> to vector<8xf32>
      %242 = vector.shape_cast %241 : vector<8xf32> to vector<8x1xf32>
      %243 = arith.maximumf %arg12, %242 : vector<8x1xf32>
      %244 = arith.subf %arg12, %243 : vector<8x1xf32>
      %245 = math.exp2 %244 : vector<8x1xf32>
      %246 = vector.broadcast %243 : vector<8x1xf32> to vector<8x8xf32>
      %247 = arith.subf %240, %246 : vector<8x8xf32>
      %248 = math.exp2 %247 : vector<8x8xf32>
      %249 = arith.mulf %245, %arg13 : vector<8x1xf32>
      %cst_76 = arith.constant dense<0.000000e+00> : vector<8xf32>
      %250 = vector.multi_reduction <add>, %248, %cst_76 [1] : vector<8x8xf32> to vector<8xf32>
      %251 = vector.shape_cast %250 : vector<8xf32> to vector<8x1xf32>
      %252 = arith.addf %249, %251 : vector<8x1xf32>
      %253 = arith.truncf %248 : vector<8x8xf32> to vector<8x8xbf16>
      %cst_77 = arith.constant dense<0.000000e+00> : vector<8x8xf32>
      %254 = tpu.matmul %253, %239, %cst_77 {dimension_numbers = #tpu.dot_dimension_numbers<[1], [0], [0], [1], [0, 0, 1, 1], [], []>} : vector<8x8xbf16>, vector<8x8xbf16>, vector<8x8xf32> -> vector<8x8xf32>
      %255 = vector.broadcast %245 : vector<8x1xf32> to vector<8x8xf32>
      %256 = arith.mulf %255, %arg14 : vector<8x8xf32>
      %257 = arith.addf %256, %254 : vector<8x8xf32>
      scf.yield %243, %252, %257 : vector<8x1xf32>, vector<8x1xf32>, vector<8x8xf32>
    }
    %103 = vector.extract_strided_slice %33 {offsets = [0, 0], sizes = [8, 8], strides = [1, 1]} : vector<8x16xbf16> to vector<8x8xbf16>
    %104 = vector.extract_strided_slice %34 {offsets = [0, 0], sizes = [8, 8], strides = [1, 1]} : vector<8x16xbf16> to vector<8x8xbf16>
    %cst_30 = arith.constant dense<0.000000e+00> : vector<8x8xf32>
    %105 = tpu.matmul %96, %103, %cst_30 {dimension_numbers = #tpu.dot_dimension_numbers<[1], [1], [0], [0], [0, 0, 1, 0], [], []>} : vector<8x8xbf16>, vector<8x8xbf16>, vector<8x8xf32> -> vector<8x8xf32>
    %cst_31 = arith.constant 0xFF800000 : f32
    %106 = vector.broadcast %cst_31 : f32 to vector<8x8xf32>
    %107 = arith.select %95, %105, %106 : vector<8x8xi1>, vector<8x8xf32>
    %cst_32 = arith.constant dense<0xFF800000> : vector<8xf32>
    %108 = vector.multi_reduction <maximumf>, %107, %cst_32 [1] : vector<8x8xf32> to vector<8xf32>
    %109 = vector.shape_cast %108 : vector<8xf32> to vector<8x1xf32>
    %110 = arith.maximumf %102#0, %109 : vector<8x1xf32>
    %111 = arith.subf %102#0, %110 : vector<8x1xf32>
    %112 = math.exp2 %111 : vector<8x1xf32>
    %113 = vector.broadcast %110 : vector<8x1xf32> to vector<8x8xf32>
    %114 = arith.subf %107, %113 : vector<8x8xf32>
    %115 = math.exp2 %114 : vector<8x8xf32>
    %116 = arith.mulf %112, %102#1 : vector<8x1xf32>
    %cst_33 = arith.constant dense<0.000000e+00> : vector<8xf32>
    %117 = vector.multi_reduction <add>, %115, %cst_33 [1] : vector<8x8xf32> to vector<8xf32>
    %118 = vector.shape_cast %117 : vector<8xf32> to vector<8x1xf32>
    %119 = arith.addf %116, %118 : vector<8x1xf32>
    %120 = arith.truncf %115 : vector<8x8xf32> to vector<8x8xbf16>
    %cst_34 = arith.constant dense<0.000000e+00> : vector<8x8xf32>
    %121 = tpu.matmul %120, %104, %cst_34 {dimension_numbers = #tpu.dot_dimension_numbers<[1], [0], [0], [1], [0, 0, 1, 1], [], []>} : vector<8x8xbf16>, vector<8x8xbf16>, vector<8x8xf32> -> vector<8x8xf32>
    %122 = vector.broadcast %112 : vector<8x1xf32> to vector<8x8xf32>
    %123 = arith.mulf %122, %102#2 : vector<8x8xf32>
    %124 = arith.addf %123, %121 : vector<8x8xf32>
    %125 = tpu.reciprocal %119 : vector<8x1xf32> -> vector<8x1xf32>
    %126 = vector.broadcast %125 : vector<8x1xf32> to vector<8x8xf32>
    %127 = arith.mulf %124, %126 : vector<8x8xf32>
    %128 = arith.truncf %127 : vector<8x8xf32> to vector<8x8xbf16>
    %129 = vector.extract_strided_slice %92 {offsets = [0, 8], sizes = [8, 8], strides = [1, 1]} : vector<8x32xbf16> to vector<8x8xbf16>
    %cst_35 = arith.constant 0xFF800000 : f32
    %130 = vector.broadcast %cst_35 : f32 to vector<8x1xf32>
    %cst_36 = arith.constant 0.000000e+00 : f32
    %131 = vector.broadcast %cst_36 : f32 to vector<8x1xf32>
    %cst_37 = arith.constant 0.000000e+00 : f32
    %132 = vector.broadcast %cst_37 : f32 to vector<8x8xf32>
    %c0_i32_38 = arith.constant 0 : i32
    %133 = arith.subi %arg1, %c0_i32_38 : i32
    %134 = arith.addi %c0_i32_38, %133 : i32
    %c1_i32_39 = arith.constant 1 : i32
    %135:3 = scf.for %arg11 = %c0_i32_38 to %134 step %c1_i32_39 iter_args(%arg12 = %130, %arg13 = %131, %arg14 = %132) -> (vector<8x1xf32>, vector<8x1xf32>, vector<8x8xf32>)  : i32 {
      %c8_i32_71 = arith.constant 8 : i32
      %234 = arith.muli %arg11, %c8_i32_71 : i32
      %235 = tpu.assume_multiple %234, 8 : i32
      %236 = arith.index_cast %235 : i32 to index
      %c0_72 = arith.constant 0 : index
      %237 = vector.load %arg9[%236, %c0_72] : memref<16x16xbf16, #tpu.memory_space<vmem>>, vector<8x8xbf16>
      %238 = arith.index_cast %235 : i32 to index
      %c0_73 = arith.constant 0 : index
      %239 = vector.load %arg10[%238, %c0_73] : memref<16x16xbf16, #tpu.memory_space<vmem>>, vector<8x8xbf16>
      %cst_74 = arith.constant dense<0.000000e+00> : vector<8x8xf32>
      %240 = tpu.matmul %129, %237, %cst_74 {dimension_numbers = #tpu.dot_dimension_numbers<[1], [1], [0], [0], [0, 0, 1, 0], [], []>} : vector<8x8xbf16>, vector<8x8xbf16>, vector<8x8xf32> -> vector<8x8xf32>
      %cst_75 = arith.constant dense<0xFF800000> : vector<8xf32>
      %241 = vector.multi_reduction <maximumf>, %240, %cst_75 [1] : vector<8x8xf32> to vector<8xf32>
      %242 = vector.shape_cast %241 : vector<8xf32> to vector<8x1xf32>
      %243 = arith.maximumf %arg12, %242 : vector<8x1xf32>
      %244 = arith.subf %arg12, %243 : vector<8x1xf32>
      %245 = math.exp2 %244 : vector<8x1xf32>
      %246 = vector.broadcast %243 : vector<8x1xf32> to vector<8x8xf32>
      %247 = arith.subf %240, %246 : vector<8x8xf32>
      %248 = math.exp2 %247 : vector<8x8xf32>
      %249 = arith.mulf %245, %arg13 : vector<8x1xf32>
      %cst_76 = arith.constant dense<0.000000e+00> : vector<8xf32>
      %250 = vector.multi_reduction <add>, %248, %cst_76 [1] : vector<8x8xf32> to vector<8xf32>
      %251 = vector.shape_cast %250 : vector<8xf32> to vector<8x1xf32>
      %252 = arith.addf %249, %251 : vector<8x1xf32>
      %253 = arith.truncf %248 : vector<8x8xf32> to vector<8x8xbf16>
      %cst_77 = arith.constant dense<0.000000e+00> : vector<8x8xf32>
      %254 = tpu.matmul %253, %239, %cst_77 {dimension_numbers = #tpu.dot_dimension_numbers<[1], [0], [0], [1], [0, 0, 1, 1], [], []>} : vector<8x8xbf16>, vector<8x8xbf16>, vector<8x8xf32> -> vector<8x8xf32>
      %255 = vector.broadcast %245 : vector<8x1xf32> to vector<8x8xf32>
      %256 = arith.mulf %255, %arg14 : vector<8x8xf32>
      %257 = arith.addf %256, %254 : vector<8x8xf32>
      scf.yield %243, %252, %257 : vector<8x1xf32>, vector<8x1xf32>, vector<8x8xf32>
    }
    %136 = vector.extract_strided_slice %33 {offsets = [0, 0], sizes = [8, 8], strides = [1, 1]} : vector<8x16xbf16> to vector<8x8xbf16>
    %137 = vector.extract_strided_slice %34 {offsets = [0, 0], sizes = [8, 8], strides = [1, 1]} : vector<8x16xbf16> to vector<8x8xbf16>
    %cst_40 = arith.constant dense<0.000000e+00> : vector<8x8xf32>
    %138 = tpu.matmul %129, %136, %cst_40 {dimension_numbers = #tpu.dot_dimension_numbers<[1], [1], [0], [0], [0, 0, 1, 0], [], []>} : vector<8x8xbf16>, vector<8x8xbf16>, vector<8x8xf32> -> vector<8x8xf32>
    %cst_41 = arith.constant 0xFF800000 : f32
    %139 = vector.broadcast %cst_41 : f32 to vector<8x8xf32>
    %140 = arith.select %95, %138, %139 : vector<8x8xi1>, vector<8x8xf32>
    %cst_42 = arith.constant dense<0xFF800000> : vector<8xf32>
    %141 = vector.multi_reduction <maximumf>, %140, %cst_42 [1] : vector<8x8xf32> to vector<8xf32>
    %142 = vector.shape_cast %141 : vector<8xf32> to vector<8x1xf32>
    %143 = arith.maximumf %135#0, %142 : vector<8x1xf32>
    %144 = arith.subf %135#0, %143 : vector<8x1xf32>
    %145 = math.exp2 %144 : vector<8x1xf32>
    %146 = vector.broadcast %143 : vector<8x1xf32> to vector<8x8xf32>
    %147 = arith.subf %140, %146 : vector<8x8xf32>
    %148 = math.exp2 %147 : vector<8x8xf32>
    %149 = arith.mulf %145, %135#1 : vector<8x1xf32>
    %cst_43 = arith.constant dense<0.000000e+00> : vector<8xf32>
    %150 = vector.multi_reduction <add>, %148, %cst_43 [1] : vector<8x8xf32> to vector<8xf32>
    %151 = vector.shape_cast %150 : vector<8xf32> to vector<8x1xf32>
    %152 = arith.addf %149, %151 : vector<8x1xf32>
    %153 = arith.truncf %148 : vector<8x8xf32> to vector<8x8xbf16>
    %cst_44 = arith.constant dense<0.000000e+00> : vector<8x8xf32>
    %154 = tpu.matmul %153, %137, %cst_44 {dimension_numbers = #tpu.dot_dimension_numbers<[1], [0], [0], [1], [0, 0, 1, 1], [], []>} : vector<8x8xbf16>, vector<8x8xbf16>, vector<8x8xf32> -> vector<8x8xf32>
    %155 = vector.broadcast %145 : vector<8x1xf32> to vector<8x8xf32>
    %156 = arith.mulf %155, %135#2 : vector<8x8xf32>
    %157 = arith.addf %156, %154 : vector<8x8xf32>
    %158 = tpu.reciprocal %152 : vector<8x1xf32> -> vector<8x1xf32>
    %159 = vector.broadcast %158 : vector<8x1xf32> to vector<8x8xf32>
    %160 = arith.mulf %157, %159 : vector<8x8xf32>
    %161 = arith.truncf %160 : vector<8x8xf32> to vector<8x8xbf16>
    %162 = vector.extract_strided_slice %92 {offsets = [0, 16], sizes = [8, 8], strides = [1, 1]} : vector<8x32xbf16> to vector<8x8xbf16>
    %cst_45 = arith.constant 0xFF800000 : f32
    %163 = vector.broadcast %cst_45 : f32 to vector<8x1xf32>
    %cst_46 = arith.constant 0.000000e+00 : f32
    %164 = vector.broadcast %cst_46 : f32 to vector<8x1xf32>
    %cst_47 = arith.constant 0.000000e+00 : f32
    %165 = vector.broadcast %cst_47 : f32 to vector<8x8xf32>
    %c0_i32_48 = arith.constant 0 : i32
    %166 = arith.subi %arg1, %c0_i32_48 : i32
    %167 = arith.addi %c0_i32_48, %166 : i32
    %c1_i32_49 = arith.constant 1 : i32
    %168:3 = scf.for %arg11 = %c0_i32_48 to %167 step %c1_i32_49 iter_args(%arg12 = %163, %arg13 = %164, %arg14 = %165) -> (vector<8x1xf32>, vector<8x1xf32>, vector<8x8xf32>)  : i32 {
      %c8_i32_71 = arith.constant 8 : i32
      %234 = arith.muli %arg11, %c8_i32_71 : i32
      %235 = tpu.assume_multiple %234, 8 : i32
      %236 = arith.index_cast %235 : i32 to index
      %c8 = arith.constant 8 : index
      %237 = vector.load %arg9[%236, %c8] : memref<16x16xbf16, #tpu.memory_space<vmem>>, vector<8x8xbf16>
      %238 = arith.index_cast %235 : i32 to index
      %c8_72 = arith.constant 8 : index
      %239 = vector.load %arg10[%238, %c8_72] : memref<16x16xbf16, #tpu.memory_space<vmem>>, vector<8x8xbf16>
      %cst_73 = arith.constant dense<0.000000e+00> : vector<8x8xf32>
      %240 = tpu.matmul %162, %237, %cst_73 {dimension_numbers = #tpu.dot_dimension_numbers<[1], [1], [0], [0], [0, 0, 1, 0], [], []>} : vector<8x8xbf16>, vector<8x8xbf16>, vector<8x8xf32> -> vector<8x8xf32>
      %cst_74 = arith.constant dense<0xFF800000> : vector<8xf32>
      %241 = vector.multi_reduction <maximumf>, %240, %cst_74 [1] : vector<8x8xf32> to vector<8xf32>
      %242 = vector.shape_cast %241 : vector<8xf32> to vector<8x1xf32>
      %243 = arith.maximumf %arg12, %242 : vector<8x1xf32>
      %244 = arith.subf %arg12, %243 : vector<8x1xf32>
      %245 = math.exp2 %244 : vector<8x1xf32>
      %246 = vector.broadcast %243 : vector<8x1xf32> to vector<8x8xf32>
      %247 = arith.subf %240, %246 : vector<8x8xf32>
      %248 = math.exp2 %247 : vector<8x8xf32>
      %249 = arith.mulf %245, %arg13 : vector<8x1xf32>
      %cst_75 = arith.constant dense<0.000000e+00> : vector<8xf32>
      %250 = vector.multi_reduction <add>, %248, %cst_75 [1] : vector<8x8xf32> to vector<8xf32>
      %251 = vector.shape_cast %250 : vector<8xf32> to vector<8x1xf32>
      %252 = arith.addf %249, %251 : vector<8x1xf32>
      %253 = arith.truncf %248 : vector<8x8xf32> to vector<8x8xbf16>
      %cst_76 = arith.constant dense<0.000000e+00> : vector<8x8xf32>
      %254 = tpu.matmul %253, %239, %cst_76 {dimension_numbers = #tpu.dot_dimension_numbers<[1], [0], [0], [1], [0, 0, 1, 1], [], []>} : vector<8x8xbf16>, vector<8x8xbf16>, vector<8x8xf32> -> vector<8x8xf32>
      %255 = vector.broadcast %245 : vector<8x1xf32> to vector<8x8xf32>
      %256 = arith.mulf %255, %arg14 : vector<8x8xf32>
      %257 = arith.addf %256, %254 : vector<8x8xf32>
      scf.yield %243, %252, %257 : vector<8x1xf32>, vector<8x1xf32>, vector<8x8xf32>
    }
    %169 = vector.extract_strided_slice %33 {offsets = [0, 8], sizes = [8, 8], strides = [1, 1]} : vector<8x16xbf16> to vector<8x8xbf16>
    %170 = vector.extract_strided_slice %34 {offsets = [0, 8], sizes = [8, 8], strides = [1, 1]} : vector<8x16xbf16> to vector<8x8xbf16>
    %cst_50 = arith.constant dense<0.000000e+00> : vector<8x8xf32>
    %171 = tpu.matmul %162, %169, %cst_50 {dimension_numbers = #tpu.dot_dimension_numbers<[1], [1], [0], [0], [0, 0, 1, 0], [], []>} : vector<8x8xbf16>, vector<8x8xbf16>, vector<8x8xf32> -> vector<8x8xf32>
    %cst_51 = arith.constant 0xFF800000 : f32
    %172 = vector.broadcast %cst_51 : f32 to vector<8x8xf32>
    %173 = arith.select %95, %171, %172 : vector<8x8xi1>, vector<8x8xf32>
    %cst_52 = arith.constant dense<0xFF800000> : vector<8xf32>
    %174 = vector.multi_reduction <maximumf>, %173, %cst_52 [1] : vector<8x8xf32> to vector<8xf32>
    %175 = vector.shape_cast %174 : vector<8xf32> to vector<8x1xf32>
    %176 = arith.maximumf %168#0, %175 : vector<8x1xf32>
    %177 = arith.subf %168#0, %176 : vector<8x1xf32>
    %178 = math.exp2 %177 : vector<8x1xf32>
    %179 = vector.broadcast %176 : vector<8x1xf32> to vector<8x8xf32>
    %180 = arith.subf %173, %179 : vector<8x8xf32>
    %181 = math.exp2 %180 : vector<8x8xf32>
    %182 = arith.mulf %178, %168#1 : vector<8x1xf32>
    %cst_53 = arith.constant dense<0.000000e+00> : vector<8xf32>
    %183 = vector.multi_reduction <add>, %181, %cst_53 [1] : vector<8x8xf32> to vector<8xf32>
    %184 = vector.shape_cast %183 : vector<8xf32> to vector<8x1xf32>
    %185 = arith.addf %182, %184 : vector<8x1xf32>
    %186 = arith.truncf %181 : vector<8x8xf32> to vector<8x8xbf16>
    %cst_54 = arith.constant dense<0.000000e+00> : vector<8x8xf32>
    %187 = tpu.matmul %186, %170, %cst_54 {dimension_numbers = #tpu.dot_dimension_numbers<[1], [0], [0], [1], [0, 0, 1, 1], [], []>} : vector<8x8xbf16>, vector<8x8xbf16>, vector<8x8xf32> -> vector<8x8xf32>
    %188 = vector.broadcast %178 : vector<8x1xf32> to vector<8x8xf32>
    %189 = arith.mulf %188, %168#2 : vector<8x8xf32>
    %190 = arith.addf %189, %187 : vector<8x8xf32>
    %191 = tpu.reciprocal %185 : vector<8x1xf32> -> vector<8x1xf32>
    %192 = vector.broadcast %191 : vector<8x1xf32> to vector<8x8xf32>
    %193 = arith.mulf %190, %192 : vector<8x8xf32>
    %194 = arith.truncf %193 : vector<8x8xf32> to vector<8x8xbf16>
    %195 = vector.extract_strided_slice %92 {offsets = [0, 24], sizes = [8, 8], strides = [1, 1]} : vector<8x32xbf16> to vector<8x8xbf16>
    %cst_55 = arith.constant 0xFF800000 : f32
    %196 = vector.broadcast %cst_55 : f32 to vector<8x1xf32>
    %cst_56 = arith.constant 0.000000e+00 : f32
    %197 = vector.broadcast %cst_56 : f32 to vector<8x1xf32>
    %cst_57 = arith.constant 0.000000e+00 : f32
    %198 = vector.broadcast %cst_57 : f32 to vector<8x8xf32>
    %c0_i32_58 = arith.constant 0 : i32
    %199 = arith.subi %arg1, %c0_i32_58 : i32
    %200 = arith.addi %c0_i32_58, %199 : i32
    %c1_i32_59 = arith.constant 1 : i32
    %201:3 = scf.for %arg11 = %c0_i32_58 to %200 step %c1_i32_59 iter_args(%arg12 = %196, %arg13 = %197, %arg14 = %198) -> (vector<8x1xf32>, vector<8x1xf32>, vector<8x8xf32>)  : i32 {
      %c8_i32_71 = arith.constant 8 : i32
      %234 = arith.muli %arg11, %c8_i32_71 : i32
      %235 = tpu.assume_multiple %234, 8 : i32
      %236 = arith.index_cast %235 : i32 to index
      %c8 = arith.constant 8 : index
      %237 = vector.load %arg9[%236, %c8] : memref<16x16xbf16, #tpu.memory_space<vmem>>, vector<8x8xbf16>
      %238 = arith.index_cast %235 : i32 to index
      %c8_72 = arith.constant 8 : index
      %239 = vector.load %arg10[%238, %c8_72] : memref<16x16xbf16, #tpu.memory_space<vmem>>, vector<8x8xbf16>
      %cst_73 = arith.constant dense<0.000000e+00> : vector<8x8xf32>
      %240 = tpu.matmul %195, %237, %cst_73 {dimension_numbers = #tpu.dot_dimension_numbers<[1], [1], [0], [0], [0, 0, 1, 0], [], []>} : vector<8x8xbf16>, vector<8x8xbf16>, vector<8x8xf32> -> vector<8x8xf32>
      %cst_74 = arith.constant dense<0xFF800000> : vector<8xf32>
      %241 = vector.multi_reduction <maximumf>, %240, %cst_74 [1] : vector<8x8xf32> to vector<8xf32>
      %242 = vector.shape_cast %241 : vector<8xf32> to vector<8x1xf32>
      %243 = arith.maximumf %arg12, %242 : vector<8x1xf32>
      %244 = arith.subf %arg12, %243 : vector<8x1xf32>
      %245 = math.exp2 %244 : vector<8x1xf32>
      %246 = vector.broadcast %243 : vector<8x1xf32> to vector<8x8xf32>
      %247 = arith.subf %240, %246 : vector<8x8xf32>
      %248 = math.exp2 %247 : vector<8x8xf32>
      %249 = arith.mulf %245, %arg13 : vector<8x1xf32>
      %cst_75 = arith.constant dense<0.000000e+00> : vector<8xf32>
      %250 = vector.multi_reduction <add>, %248, %cst_75 [1] : vector<8x8xf32> to vector<8xf32>
      %251 = vector.shape_cast %250 : vector<8xf32> to vector<8x1xf32>
      %252 = arith.addf %249, %251 : vector<8x1xf32>
      %253 = arith.truncf %248 : vector<8x8xf32> to vector<8x8xbf16>
      %cst_76 = arith.constant dense<0.000000e+00> : vector<8x8xf32>
      %254 = tpu.matmul %253, %239, %cst_76 {dimension_numbers = #tpu.dot_dimension_numbers<[1], [0], [0], [1], [0, 0, 1, 1], [], []>} : vector<8x8xbf16>, vector<8x8xbf16>, vector<8x8xf32> -> vector<8x8xf32>
      %255 = vector.broadcast %245 : vector<8x1xf32> to vector<8x8xf32>
      %256 = arith.mulf %255, %arg14 : vector<8x8xf32>
      %257 = arith.addf %256, %254 : vector<8x8xf32>
      scf.yield %243, %252, %257 : vector<8x1xf32>, vector<8x1xf32>, vector<8x8xf32>
    }
    %202 = vector.extract_strided_slice %33 {offsets = [0, 8], sizes = [8, 8], strides = [1, 1]} : vector<8x16xbf16> to vector<8x8xbf16>
    %203 = vector.extract_strided_slice %34 {offsets = [0, 8], sizes = [8, 8], strides = [1, 1]} : vector<8x16xbf16> to vector<8x8xbf16>
    %cst_60 = arith.constant dense<0.000000e+00> : vector<8x8xf32>
    %204 = tpu.matmul %195, %202, %cst_60 {dimension_numbers = #tpu.dot_dimension_numbers<[1], [1], [0], [0], [0, 0, 1, 0], [], []>} : vector<8x8xbf16>, vector<8x8xbf16>, vector<8x8xf32> -> vector<8x8xf32>
    %cst_61 = arith.constant 0xFF800000 : f32
    %205 = vector.broadcast %cst_61 : f32 to vector<8x8xf32>
    %206 = arith.select %95, %204, %205 : vector<8x8xi1>, vector<8x8xf32>
    %cst_62 = arith.constant dense<0xFF800000> : vector<8xf32>
    %207 = vector.multi_reduction <maximumf>, %206, %cst_62 [1] : vector<8x8xf32> to vector<8xf32>
    %208 = vector.shape_cast %207 : vector<8xf32> to vector<8x1xf32>
    %209 = arith.maximumf %201#0, %208 : vector<8x1xf32>
    %210 = arith.subf %201#0, %209 : vector<8x1xf32>
    %211 = math.exp2 %210 : vector<8x1xf32>
    %212 = vector.broadcast %209 : vector<8x1xf32> to vector<8x8xf32>
    %213 = arith.subf %206, %212 : vector<8x8xf32>
    %214 = math.exp2 %213 : vector<8x8xf32>
    %215 = arith.mulf %211, %201#1 : vector<8x1xf32>
    %cst_63 = arith.constant dense<0.000000e+00> : vector<8xf32>
    %216 = vector.multi_reduction <add>, %214, %cst_63 [1] : vector<8x8xf32> to vector<8xf32>
    %217 = vector.shape_cast %216 : vector<8xf32> to vector<8x1xf32>
    %218 = arith.addf %215, %217 : vector<8x1xf32>
    %219 = arith.truncf %214 : vector<8x8xf32> to vector<8x8xbf16>
    %cst_64 = arith.constant dense<0.000000e+00> : vector<8x8xf32>
    %220 = tpu.matmul %219, %203, %cst_64 {dimension_numbers = #tpu.dot_dimension_numbers<[1], [0], [0], [1], [0, 0, 1, 1], [], []>} : vector<8x8xbf16>, vector<8x8xbf16>, vector<8x8xf32> -> vector<8x8xf32>
    %221 = vector.broadcast %211 : vector<8x1xf32> to vector<8x8xf32>
    %222 = arith.mulf %221, %201#2 : vector<8x8xf32>
    %223 = arith.addf %222, %220 : vector<8x8xf32>
    %224 = tpu.reciprocal %218 : vector<8x1xf32> -> vector<8x1xf32>
    %225 = vector.broadcast %224 : vector<8x1xf32> to vector<8x8xf32>
    %226 = arith.mulf %223, %225 : vector<8x8xf32>
    %227 = arith.truncf %226 : vector<8x8xf32> to vector<8x8xbf16>
    %228 = tpu.concatenate %128, %161, %194, %227 in 1 : vector<8x8xbf16>, vector<8x8xbf16>, vector<8x8xbf16>, vector<8x8xbf16> -> vector<8x32xbf16>
    %c0_65 = arith.constant 0 : index
    %c0_66 = arith.constant 0 : index
    %229 = vector.load %arg6[%c0_65, %c0_66] : memref<32x32xbf16, #tpu.memory_space<vmem>>, vector<32x32xbf16>
    %cst_67 = arith.constant dense<0.000000e+00> : vector<8x32xf32>
    %230 = tpu.matmul %228, %229, %cst_67 {dimension_numbers = #tpu.dot_dimension_numbers<[1], [0], [0], [1], [0, 0, 1, 1], [], []>} : vector<8x32xbf16>, vector<32x32xbf16>, vector<8x32xf32> -> vector<8x32xf32>
    %c0_68 = arith.constant 0 : index
    %c0_69 = arith.constant 0 : index
    %c0_70 = arith.constant 0 : index
    %231 = vector.load %arg8[%c0_68, %c0_69, %c0_70] : memref<1x8x32xf32, #tpu.memory_space<vmem>>, vector<1x8x32xf32>
    %232 = vector.shape_cast %231 : vector<1x8x32xf32> to vector<8x32xf32>
    %233 = vector.shape_cast %230 : vector<8x32xf32> to vector<1x8x32xf32>
    tpu.vector_store %arg8[%c0_68, %c0_69, %c0_70], %233 {strides = array<i32>} : memref<1x8x32xf32, #tpu.memory_space<vmem>>, vector<1x8x32xf32>,
    return
  }
  func.func @transform_0(%arg0: i32, %arg1: i32) -> (i32, i32, i32) {
    %c0_i32 = arith.constant 0 : i32
    %c0_i32_0 = arith.constant 0 : i32
    return %arg0, %arg1, %c0_i32 : i32, i32, i32
  }
  func.func @transform_1(%arg0: i32, %arg1: i32) -> (i32, i32) {
    %c0_i32 = arith.constant 0 : i32
    %c0_i32_0 = arith.constant 0 : i32
    %c0_i32_1 = arith.constant 0 : i32
    return %c0_i32, %c0_i32_0 : i32, i32
  }
  func.func @transform_2(%arg0: i32, %arg1: i32) -> (i32, i32) {
    %c0_i32 = arith.constant 0 : i32
    %c0_i32_0 = arith.constant 0 : i32
    %c0_i32_1 = arith.constant 0 : i32
    return %c0_i32, %c0_i32_0 : i32, i32
  }
  func.func @transform_3(%arg0: i32, %arg1: i32) -> (i32, i32) {
    %c0_i32 = arith.constant 0 : i32
    %c0_i32_0 = arith.constant 0 : i32
    %c0_i32_1 = arith.constant 0 : i32
    return %c0_i32, %c0_i32_0 : i32, i32
  }
  func.func @transform_4(%arg0: i32, %arg1: i32) -> (i32, i32) {
    %c0_i32 = arith.constant 0 : i32
    %c0_i32_0 = arith.constant 0 : i32
    %c0_i32_1 = arith.constant 0 : i32
    return %c0_i32, %c0_i32_0 : i32, i32
  }
  func.func @transform_5(%arg0: i32, %arg1: i32) -> (i32, i32) {
    %c0_i32 = arith.constant 0 : i32
    %c0_i32_0 = arith.constant 0 : i32
    return %arg1, %c0_i32 : i32, i32
  }
  func.func @transform_6(%arg0: i32, %arg1: i32) -> (i32, i32, i32) {
    %c0_i32 = arith.constant 0 : i32
    %c0_i32_0 = arith.constant 0 : i32
    return %arg0, %arg1, %c0_i32 : i32, i32, i32
  }
}

</mosaic_0001>

<bundles_post_ra>
// kernel: tpu_custom_call.1
= control target key start
LH: loop header
LB: loop body
LE: loop exit
PB: predicated region body
PF: predicated region fallthrough
CT: control target
= control target key end

     0   :  { %s3434_s0 = inlined_call_operand.vmem [shape: bf16[2,16,32], index: 0, kind: input, shape index: {}]   ;;  %s3435_s1 = inlined_call_operand.vmem [shape: bf16[32,32], index: 1, kind: input, shape index: {}]   ;;  %s3436_s2 = inlined_call_operand.vmem [shape: bf16[32,16], index: 2, kind: input, shape index: {}]   ;;  %s3437_s3 = inlined_call_operand.vmem [shape: bf16[32,16], index: 3, kind: input, shape index: {}]   ;;  %s3438_s4 = inlined_call_operand.vmem [shape: bf16[32,32], index: 4, kind: input, shape index: {}]   ;;  %s3439_s5 = inlined_call_operand.vmem [shape: f32[16,8], index: 5, kind: input, shape index: {}]   ;;  %s3440_s6 = inlined_call_operand.hbm [shape: f32[2,16,32], index: 6, kind: output, shape index: {}]  }
   0x1   :  { %3445 = sst [smem:[#allocation10_spill]] %s3436_s2 }
   0x2   :  { %11 = vsyncpa [#allocation5], 0 }
   0x3   :  { %13 = vsyncpa [#allocation5 + $0x1], 0  ;;  %s2872_s21 = smov 0   ;;  %s2874_s22 = smov 0  }
   0x4   :  { %s2876_s23 = smov 0   ;;  %s2878_s24 = smov 0  }
   0x5   :  { %s2880_s25 = smov 0   ;;  %s2882_s26 = smov 0  }
   0x6   :  { %s2884_s27 = smov 0   ;;  %s2886_s28 = smov 0  }
   0x7 LB: > { %3446 = sst [smem:[#allocation7_spill]] %s2692_s27  ;;  %s1872_s29 = sadd.s32 4294967295, %s2696_s28   ;;  %s2696_s28 = sphi %s2886_s28, %s19_s28   ;;  %s2692_s27 = sphi %s2884_s27, %s3475_s27   ;;  %s2688_s26 = sphi %s2882_s26, %s3480_s26   ;;  %s2684_s25 = sphi %s2880_s25, %s3473_s25   ;;  %s2680_s24 = sphi %s2878_s24, %s3479_s24   ;;  %s2676_s23 = sphi %s2876_s23, %s3478_s23   ;;  %s2672_s22 = sphi %s2874_s22, %s3477_s22   ;;  %s2668_s21 = sphi %s2872_s21, %s3476_s21  }
   0x8   : > { %s1873_s30 = sadd.s32 4294967294, %s2696_s28   ;;  %s28_s7 = sadd.s32 1, %s2688_s26 }
   0x9   : > { %p29_p0 = scmp.ge.s32.totalorder %s28_s7, 2  ;;  %s31_s8 = sadd.s32 1, %s2692_s27 }
   0xa   : > { %p188_p1 = scmp.ne.s32.totalorder %s2676_s23, %s2672_s22  ;;  %p189_p2 = scmp.eq.s32.totalorder %s1872_s29, 3 }
   0xb   : > { %s3482_s7 = smov (%p29_p0, %s28_s7), 0  ;;  %s3484_s8 = smov (!%p29_p0, %s31_s8), %s2692_s27 }
   0xc   : > { %3447 = sst [smem:[#allocation8_spill]] %s3482_s7  ;;  %s174_s9 = ssub.s32 %s2688_s26, %s3482_s7 }
   0xd   : > { %p2923_p3 = por %p189_p2, %p188_p1  ;;  %p33_p4 = scmp.ge.s32.totalorder %s3484_s8, 2 }
   0xe   : > { %p194_p5 = scmp.ne.s32.totalorder %s2672_s22, %s2668_s21  ;;  %p195_p6 = scmp.eq.s32.totalorder %s1873_s30, 3 }
   0xf   : > { %p1876_p7 = scmp.ge.s32.totalorder %s2696_s28, 1  ;;  %s3486_s8 = smov (%p33_p4, %s3484_s8), 0 }
  0x10   : > { %3449 = sst [smem:[#allocation9_spill]] %s3486_s8  ;;  %p2932_p8 = por %p195_p6, %p194_p5 }
  0x11   : > { %p243_p9 = scmp.lt.s32.totalorder %s2696_s28, 5  ;;  %s173_s12 = ssub.s32 %s2692_s27, %s3486_s8 }
  0x12   : > { %s178_s13 = sadd.s32 1, %s2676_s23  ;;  %s175_s14 = sor.u32 %s174_s9, %s173_s12 }
  0x13   : > { %p244_p10 = pnand %p1876_p7, %p243_p9  ;;  %p176_p11 = scmp.eq.s32.totalorder %s175_s14, 0 }
  0x14   : > { %s3441_s16 = sand.u32 (!%p244_p10), 1, %s2672_s22   ;;  %s3451_s2 = sld [smem:[#allocation10_spill]] (!%p244_p10) }
  0x15   : > { %s2941_s15 = scalar_select %p176_p11, %s2676_s23, %s178_s13  }
  0x16   : > { %247 = sbr.rel (%p244_p10) target bundleno = 5978 (0x175a), region = 44  ;;  %s2946_s17 = sshll.u32 (!%p244_p10), %s3441_s16, 3 }
  0x17   : > { %p280_p12 = scmp.lt.s32.totalorder (!%p244_p10), %s2684_s25, 1  ;;  %p282_p13 = scmp.lt.s32.totalorder (!%p244_p10), %s2680_s24, 1 }
  0x18   : > { %s2816_s7 = smov (!%p244_p10), 8   ;;  %s2817_s8 = smov (!%p244_p10), 124  }
  0x19   : > { %s2818_s16 = smov (!%p244_p10), 16   ;;  %p1893_p0 = scmp.le.s32.totalorder (!%p244_p10), %s2680_s24, 0 }
  0x1b   : > { %v2810_v0 = vmov 0.0   ;;  %v2440_v1 = vld [vmem:[%s3451_s2 + $0x8] sm:$0xff]   ;;  %v2441_v2 = vld [vmem:[%s3451_s2] sm:$0xff]   ;;  %vm2811_vm0 = vmmov 0   ;;  %s281_s30 = scalar_select %p280_p12, %s2684_s25, 1  ;;  %vm311_vm1 = vcmask 261120   ;;  %v628_v54 = vlaneseq }
  0x1c   : > { %1981 = vmatprep.subr.bf16.mxu0 %v2810_v0  ;;  %1989 = vmatprep.subr.bf16.mxu1 %v2810_v0  ;;  %s283_s9 = scalar_select %p282_p13, %s2680_s24, 1  ;;  %v2442_v3 = vld [vmem:[%s3435_s1 + $0x8] sm:$0xff]   ;;  %v2443_v6 = vld [vmem:[%s3435_s1] sm:$0xff]   ;;  %vm470_vm2 = vcmask 125952   ;;  %vm457_vm4 = vcmask 31744   ;;  %vm459_vm5 = vcmask 64512  }
  0x1d   : > { %1982 = vmatpush3.bf16.msra.mxu0 %v2440_v1  ;;  %1985 = vmatprep.mubr.msk.bf16.mxu0 %vm2811_vm0, %v2810_v0  ;;  %s1878_s12 = sshll.u32 %s281_s30, 1  ;;  %s2812_s30 = smov 20   ;;  %v2444_v7 = vld [vmem:[%s3437_s3 + $0x8] sm:$0xff]   ;;  %v2445_v8 = vld [vmem:[%s3437_s3] sm:$0xff]   ;;  %v3043_v57 = vand.u32 127, %v628_v54  ;;  %v3045_v58 = vshrl.u32 %v628_v54, 7 }
  0x1e   : > { %1983 = vmatprep.subr.bf16.mxu0 %v2810_v0  ;;  %1993 = vmatprep.mubr.msk.bf16.mxu1 %vm2811_vm0, %v2810_v0  ;;  %s285_s13 = sadd.s32 %s1878_s12, %s283_s9  ;;  %s1880_s14 = sshll.u32 %s283_s9, 3  ;;  %vm461_vm6 = vcmask 97280   ;;  %vm619_vm7 = vcmask 130048   ;;  %vm621_vm8 = vcmask 162816   ;;  %vm623_vm9 = vcmask 195584  }
  0x1f   : > { %s1879_s18 = sshll.u32 %s285_s13, 2  ;;  %s291_s29 = scalar_lea.vmem %s3439_s5, %s1880_s14  ;;  %1990 = vmatpush3.bf16.msra.mxu1 %v2444_v7  ;;  %vm632_vm3 = vcmp.le.s32.totalorder %v3043_v57, %v3045_v58  ;;  %vm625_vm10 = vcmask 228352  }
  0x20   : > { %s287_s27 = scalar_lea.vmem %s3434_s0, %s1879_s18  ;;  %v294_v4 = vld [vmem:[%s291_s29] sm:$0xff]  ;;  %s2813_s9 = smov 4   ;;  %1991 = vmatprep.subr.bf16.mxu1 %v2810_v0 }
  0x21   : > { %1984 = vmatpush3.bf16.msra.mxu0 %v2441_v2  ;;  %v293_v5 = vld [vmem:[%s287_s27] sm:$0xf]  ;;  %570 = vrot.lane.b32.xlu1 %v294_v4, %s2812_s30  ;;  %s2814_s2 = smov 28   ;;  %s2815_s27 = smov 12  }
  0x22   : > { %1997 = vmatprep.subr.bf16.mxu0 %v2810_v0  ;;  %422 = vrot.lane.b32.xlu0 %v294_v4, %s2813_s9  ;;  %s2819_s14 = smov 24   ;;  %s1887_s30 = sshll.u32 %s2680_s24, 3 }
  0x23   : > { %1992 = vmatpush3.bf16.msra.mxu1 %v2445_v8  ;;  %s3035_s12 = sshra.s32 %s1887_s30, 3 }
  0x24   : > { %1986 = vmatmul.mubr.msk.bf16.vlgmr.msra.gmra.mxu0 %vm311_vm1, %v293_v5  ;;  %s1888_s13 = sshll.u32 %s3035_s12, 2 }
  0x25   : > { %1998 = vmatpush3.bf16.msra.mxu0 %v2442_v3  ;;  %2001 = vmatprep.mubr.msk.bf16.mxu0 %vm2811_vm0, %v2810_v0 }
  0x26   : > { %1999 = vmatprep.subr.bf16.mxu0 %v2810_v0  ;;  %590 = vrot.lane.b32.xlu1 %v294_v4, %s2814_s2  ;;  %s473_s2 = scalar_lea.vmem [#allocation3], %s1888_s13 }
  0x27   : > { %440 = vrot.lane.b32.xlu0 %v294_v4, %s2815_s27  ;;  %1994 = vmatmul.mubr.msk.bf16.vlgmr.msra.gmra.mxu1 %vm311_vm1, %v293_v5  ;;  %s279_s27 = scalar_lea.vmem [#allocation4], %s2946_s17 }
  0x29   : > { %2000 = vmatpush3.bf16.msra.mxu0 %v2443_v6 }
  0x2a   : > { %431 = vrot.lane.b32.xlu1 %v294_v4, %s2816_s7 }
  0x2b   : > { %418 = vrot.lane.b32.xlu0 %v294_v4, %s2817_s8 }
  0x2c   : > { %2002 = vmatmul.mubr.msk.bf16.vlgmr.msra.gmra.mxu0 %vm311_vm1, %v293_v5 }
  0x2e   : > { %560 = vrot.lane.b32.xlu1 %v294_v4, %s2818_s16 }
  0x32   : > { %580 = vrot.lane.b32.xlu1 %v294_v4, %s2819_s14 }
  0x93   : > { %v571_v12 = vpop.permute.xlu1 %570 }
  0x94   : > { %v423_v9 = vpop.permute.xlu0 %422 }
  0x98   : > { %v591_v16 = vpop.permute.xlu1 %590 }
  0x99   : > { %v441_v21 = vpop.permute.xlu0 %440 }
  0x9c   : > { %v432_v25 = vpop.permute.xlu1 %431 }
  0x9d   : > { %v419_v36 = vpop.permute.xlu0 %418 }
  0xa0   : > { %v561_v29 = vpop.permute.xlu1 %560 }
  0xa4   : > { %v581_v34 = vpop.permute.xlu1 %580 }
  0xe4   : > { %v349_v10 = vpop.f32.mrf.mxu0 }
  0xe5   : > { %v2996_v11 = vmul.f32 %v423_v9, %v349_v10  ;;  %v3007_v27 = vmul.f32 %v349_v10, %v294_v4  ;;  %v443_v28 = vmul.f32 %v441_v21, %v349_v10  ;;  %v3020_v32 = vmul.f32 %v432_v25, %v349_v10 }
  0xe6   : > { %v1987_v13 = vpop.f32.mrf.mxu0  ;;  %v421_v43 = vmul.f32 %v419_v36, %v349_v10 }
  0xe7   : > { %427 = vrot.lane.b32.xlu0 %v2996_v11, %s2817_s8  ;;  %v405_v38 = vpop.f32.mrf.mxu1 }
  0xe8   : > { %v352_v14 = vpop.f32.mrf.mxu0  ;;  %v3033_v39 = vpack.c.bf16 %v405_v38, %v405_v38  ;;  %v3074_v38 = vmov 0.0  }
  0xe9   : > { %v1995_v40 = vpop.f32.mrf.mxu1 }
  0xea   : > { %v1988_v15 = vpop.f32.mrf.mxu0  ;;  %474 = vst.msk [vmem:[%s473_s2] sm:$0xf] %vm470_vm2, %v3033_v39  ;;  %v3076_v40 = vmov 0.0  }
  0xeb   : > { %v408_v45 = vpop.f32.mrf.mxu1 }
  0xec   : > { %v525_v17 = vpop.f32.mrf.mxu0 }
  0xed   : > { %v3000_v18 = vmul.f32 %v571_v12, %v525_v17  ;;  %v539_v19 = vmul.f32 %v525_v17, %v423_v9  ;;  %v593_v23 = vmul.f32 %v591_v16, %v525_v17  ;;  %v553_v24 = vmul.f32 %v525_v17, %v441_v21  ;;  %v1996_v49 = vpop.f32.mrf.mxu1 }
  0xee   : > { %v2003_v20 = vpop.f32.mrf.mxu0  ;;  %v3012_v30 = vmul.f32 %v525_v17, %v432_v25  ;;  %v3014_v31 = vmul.f32 %v525_v17, %v294_v4  ;;  %v3022_v33 = vmul.f32 %v561_v29, %v525_v17  ;;  %v3028_v35 = vmul.f32 %v581_v34, %v525_v17 }
  0xef   : > { %575 = vrot.lane.b32.xlu1 %v3000_v18, %s2817_s8  ;;  %541 = vrot.lane.b32.xlu0 %v539_v19, %s2817_s8  ;;  %v538_v41 = vmul.f32 %v525_v17, %v419_v36 }
  0xf0   : > { %v528_v22 = vpop.f32.mrf.mxu0 }
  0xf2   : > { %v2004_v26 = vpop.f32.mrf.mxu0 }
  0xf3   : > { %595 = vrot.lane.b32.xlu1 %v593_v23, %s2817_s8  ;;  %555 = vrot.lane.b32.xlu0 %v553_v24, %s2817_s8 }
  0xf7   : > { %413 = vrot.lane.b32.xlu1 %v3007_v27, %s2817_s8  ;;  %445 = vrot.lane.b32.xlu0 %v443_v28, %s2817_s8 }
  0xfb   : > { %548 = vrot.lane.b32.xlu1 %v3012_v30, %s2817_s8  ;;  %533 = vrot.lane.b32.xlu0 %v3014_v31, %s2817_s8 }
  0xff   : > { %436 = vrot.lane.b32.xlu1 %v3020_v32, %s2817_s8  ;;  %565 = vrot.lane.b32.xlu0 %v3022_v33, %s2817_s8 }
 0x103   : > { %585 = vrot.lane.b32.xlu0 %v3028_v35, %s2817_s8  ;;  %s3082_s8 = smov (!%p1893_p0), 0  }
 0x159   : > { %v428_v37 = vpop.permute.xlu0 %427 }
 0x15a   : > { %v430_v47 = vadd.f32 %v428_v37, %v421_v43 }
 0x161   : > { %v542_v42 = vpop.permute.xlu0 %541  ;;  %v576_v46 = vpop.permute.xlu1 %575 }
 0x162   : > { %v544_v44 = vadd.f32 %v542_v42, %v538_v41  ;;  %v578_v51 = vadd.f32 %v576_v46, %v553_v24  ;;  %v3078_v41 = vmov -inf  }
 0x164   : > { %v545_v48 = vmul.f32 0.5100697, %v544_v44  ;;  %v579_v59 = vmul.f32 0.5100697, %v578_v51 }
 0x165   : > { %v556_v50 = vpop.permute.xlu0 %555  ;;  %v596_v55 = vpop.permute.xlu1 %595 }
 0x166   : > { %v2430_v52 = vpack.i.bf16 %v430_v47, %v545_v48  ;;  %v558_v53 = vadd.f32 %v556_v50, %v539_v19  ;;  %v598_v62 = vadd.f32 %v596_v55, %v3000_v18 }
 0x168   : > { %2431 = vrot.lane.b32.xlu0 %v2430_v52, %s2813_s9  ;;  %v559_v60 = vmul.f32 0.5100697, %v558_v53  ;;  %v599_v1 = vmul.f32 0.5100697, %v598_v62 }
 0x169   : > { %v446_v56 = vpop.permute.xlu0 %445  ;;  %v414_v3 = vpop.permute.xlu1 %413 }
 0x16a   : > { %v448_v61 = vadd.f32 %v446_v56, %v2996_v11  ;;  %v416_v13 = vsub.f32 %v3007_v27, %v414_v3 }
 0x16c   : > { %v2435_v63 = vpack.i.bf16 %v448_v61, %v559_v60  ;;  %609 = vrot.lane.b32.xlu0 %v579_v59, %s2813_s9 }
 0x16d   : > { %v534_v2 = vpop.permute.xlu0 %533  ;;  %v549_v5 = vpop.permute.xlu1 %548 }
 0x16e   : > { %2436 = vrot.lane.b32.xlu1 %v2435_v63, %s2813_s9  ;;  %v536_v7 = vsub.f32 %v3014_v31, %v534_v2  ;;  %v551_v11 = vsub.f32 %v3012_v30, %v549_v5 }
 0x170   : > { %v537_v14 = vmul.f32 0.5100697, %v536_v7  ;;  %v552_v18 = vmul.f32 0.5100697, %v551_v11 }
 0x171   : > { %v566_v4 = vpop.permute.xlu0 %565  ;;  %v437_v12 = vpop.permute.xlu1 %436 }
 0x172   : > { %613 = vrot.lane.b32.xlu1 %v599_v1, %s2813_s9  ;;  %v568_v15 = vsub.f32 %v3022_v33, %v566_v4  ;;  %v439_v19 = vsub.f32 %v3020_v32, %v437_v12  ;;  %s469_s9 = scalar_lea.vmem [#allocation2], %s1888_s13 }
 0x174   : > { %v569_v24 = vmul.f32 0.5100697, %v568_v15 }
 0x175   : > { %v586_v6 = vpop.permute.xlu0 %585 }
 0x176   : > { %v588_v20 = vsub.f32 %v3028_v35, %v586_v6 }
 0x178   : > { %v589_v29 = vmul.f32 0.5100697, %v588_v20 }
 0x1da   : > { %v2432_v8 = vpop.permute.xlu0 %2431 }
 0x1db   : > { %v2434_v9 = vunpack.i.h.bf16 %v2432_v8  ;;  %v2433_v10 = vunpack.i.l.bf16 %v2432_v8 }
 0x1dd   : > { %v458_v16 = vsel %vm457_vm4, %v416_v13, %v2434_v9  ;;  %v616_v17 = vsel %vm457_vm4, %v537_v14, %v2433_v10 }
 0x1de   : > { %v460_v25 = vsel %vm459_vm5, %v458_v16, %v439_v19  ;;  %v617_v26 = vsel %vm459_vm5, %v616_v17, %v552_v18  ;;  %v610_v30 = vpop.permute.xlu0 %609 }
 0x1e0   : > { %v2437_v21 = vpop.permute.xlu1 %2436 }
 0x1e1   : > { %v2439_v22 = vunpack.i.h.bf16 %v2437_v21  ;;  %v2438_v23 = vunpack.i.l.bf16 %v2437_v21 }
 0x1e3   : > { %v462_v27 = vsel %vm461_vm6, %v460_v25, %v2439_v22  ;;  %v618_v28 = vsel %vm461_vm6, %v617_v26, %v2438_v23 }
 0x1e4   : > { %v3062_v31 = vpack.c.bf16 %v462_v27, %v462_v27  ;;  %v620_v32 = vsel %vm619_vm7, %v618_v28, %v569_v24  ;;  %v614_v34 = vpop.permute.xlu1 %613  ;;  %1783 = sbr.rel (%p1893_p0) target bundleno = 1054 (0x41e), region = 114 }
 0x1e5   : > { %v622_v33 = vsel %vm621_vm8, %v620_v32, %v610_v30 }
 0x1e6   : > { %471 = vst.msk [vmem:[%s469_s9] sm:$0xf] %vm470_vm2, %v3062_v31  ;;  %v624_v35 = vsel %vm623_vm9, %v622_v33, %v589_v29 }
 0x1e7   : > { %v626_v36 = vsel %vm625_vm10, %v624_v35, %v614_v34 }
 0x1e8   : > { %v3070_v37 = vpack.c.bf16 %v626_v36, %v626_v36 }
 0x1e9   : > { %v2698_v42 = vmov 0.0   ;;  %v2702_v43 = vmov 0.0   ;;  %v2706_v44 = vmov -inf  }
 0x1ea LB: >> { %v2820_v45 = vmov 0.0   ;;  %vm2821_vm11 = vmmov 0   ;;  %s1894_s18 = sshll.u32 %s2712_s8, 3  ;;  %vm714_vm12 = vcmask 1043456   ;;  %s636_s8 = sadd.s32 1, %s2712_s8   ;;  %s2712_s8 = sphi %s3082_s8, %s636_s8   ;;  %v2708_v44 = vphi %v2706_v44, %v2707_v44   ;;  %v2704_v43 = vphi %v2702_v43, %v2703_v43   ;;  %v2700_v42 = vphi %v2698_v42, %v2699_v42  }
 0x1eb   : >> { %2005 = vmatprep.subr.bf16.mxu0 %v2820_v45  ;;  %2007 = vmatprep.mubr.msk.bf16.mxu0 %vm2821_vm11, %v2820_v45  ;;  %s643_s19 = sshra.s32 %s1894_s18, 3  ;;  %p635_p1 = scmp.ge.s32.totalorder %s636_s8, %s2680_s24 }
 0x1ec   : >> { %2011 = vmatprep.subr.bf16.mxu1 %v2820_v45  ;;  %2013 = vmatprep.mubr.msk.bf16.mxu1 %vm2821_vm11, %v2820_v45  ;;  %s1895_s20 = sshll.u32 %s643_s19, 2 }
 0x1ed   : >> { %s646_s29 = scalar_lea.vmem [#allocation2], %s1895_s20  ;;  %s649_s30 = scalar_lea.vmem [#allocation3], %s1895_s20 }
 0x1ee   : >> { %v647_v46 = vld [vmem:[%s646_s29] sm:$0xf] }
 0x1ef   : >> { %v655_v47 = vsel %vm459_vm5, %v647_v46, 0  ;;  %v650_v53 = vld [vmem:[%s649_s30] sm:$0xf] }
 0x1f0   : >> { %2006 = vmatpush3.bf16.xpose.msra.mxu0 %v655_v47  ;;  %v716_v54 = vsel %vm714_vm12, %v650_v53, 0 }
 0x1f1   : >> { %2012 = vmatpush3.bf16.msra.mxu1 %v716_v54 }
 0x1f7   : >> { %2008 = vmatmul.mubr.msk.bf16.vlgmr.msra.gmra.mxu0 %vm459_vm5, %v3070_v37 }
 0x2b7   : >> { %v691_v48 = vpop.f32.mrf.mxu0 }
 0x2b8   : >> { %v697_v49 = vsel %vm459_vm5, %v691_v48, -inf }
 0x2b9   : >> { %698 = vmax.xlane.f32.xlu0 %v697_v49  ;;  %v2009_v50 = vpop.f32.mrf.mxu0 }
 0x2bb   : >> { %v694_v51 = vpop.f32.mrf.mxu0 }
 0x2bd   : >> { %v2010_v52 = vpop.f32.mrf.mxu0 }
 0x342   : >> { %v699_v55 = vpop.xlane.xlu0 %698 }
 0x343   : >> { %v700_v56 = vmax.f32 %v2708_v44, %v699_v55  }
 0x345   : >> { %v701_v59 = vsub.f32 %v2708_v44, %v700_v56  ;;  %v703_v60 = vsub.f32 %v691_v48, %v700_v56  ;;  %v2707_v44 = vmov %v700_v56   ;;  %v3454_v41 = vmov (%p635_p1), %v700_v56 }
 0x347   : >> { %2446 = vpow2.f32 %v703_v60 }
 0x348   : >> { %2448 = vpow2.f32 %v701_v59 }
 0x354   : >> { %v2447_v61 = vpop.eup %2446 }
 0x355   : >> { %v706_v62 = vsel %vm459_vm5, %v2447_v61, 0.0  ;;  %v710_v63 = vpack.c.bf16 %v2447_v61, %v2447_v61  ;;  %v2449_v1 = vpop.eup %2448 }
 0x356   : >> { %707 = vadd.xlane.f32.xlu0 %v706_v62  ;;  %v705_v2 = vmul.f32 %v2704_v43, %v2449_v1  ;;  %v758_v5 = vmul.f32 %v2700_v42, %v2449_v1 }
 0x357   : >> { %2014 = vmatmul.mubr.msk.bf16.vlgmr.msra.gmra.mxu1 %vm459_vm5, %v710_v63 }
 0x3df   : >> { %v708_v3 = vpop.xlane.xlu0 %707 }
 0x3e0   : >> { %v709_v4 = vadd.f32 %v708_v3, %v705_v2  }
 0x3e2   : >> { %v2703_v43 = vmov %v709_v4   ;;  %v3453_v40 = vmov (%p635_p1), %v709_v4 }
 0x417   : >> { %v752_v6 = vpop.f32.mrf.mxu1 }
 0x418   : >> { %v759_v7 = vadd.f32 %v758_v5, %v752_v6  }
 0x419   : >> { %v2015_v8 = vpop.f32.mrf.mxu1  ;;  %638 = sbr.rel (!%p635_p1) target bundleno = 490 (0x1ea), region = 120 }
 0x41a   : >> { %v2699_v42 = vmov %v759_v7   ;;  %v3452_v38 = vmov (%p635_p1), %v759_v7 }
 0x41b   : >> { %v755_v9 = vpop.f32.mrf.mxu1 }
 0x41d   : >> { %v2016_v10 = vpop.f32.mrf.mxu1 }
 0x41e PF: > { %2017 = vmatprep.subr.bf16.mxu0 %v2810_v0  ;;  %v3110_v11 = vsel %vm459_vm5, %v3062_v31, 0  ;;  %2019 = vmatprep.mubr.msk.bf16.mxu0 %vm2811_vm0, %v2810_v0  ;;  %vm824_vm13 = vcmask 1043456   ;;  %v3135_v45 = vmov 0.0   ;;  %s3147_s12 = smov (!%p1893_p0), 0   ;;  %v2724_v41 = vphi %v3078_v41, %v3454_v41   ;;  %v2720_v40 = vphi %v3076_v40, %v3453_v40   ;;  %v2716_v38 = vphi %v3074_v38, %v3452_v38  }
 0x41f   : > { %2018 = vmatpush3.bf16.xpose.msra.mxu0 %v3110_v11  ;;  %2023 = vmatprep.subr.bf16.mxu1 %v2810_v0  ;;  %v3126_v18 = vsel %vm824_vm13, %v3033_v39, 0 }
 0x420   : > { %2025 = vmatprep.mubr.msk.bf16.mxu1 %vm2811_vm0, %v2810_v0  ;;  %2024 = vmatpush3.bf16.msra.mxu1 %v3126_v18 }
 0x426   : > { %2020 = vmatmul.mubr.msk.bf16.vlgmr.msra.gmra.mxu0 %vm459_vm5, %v3070_v37 }
 0x4e6   : > { %v800_v12 = vpop.f32.mrf.mxu0 }
 0x4e7   : > { %v806_v13 = vsel %vm632_vm3, %v800_v12, -inf }
 0x4e8   : > { %v2021_v14 = vpop.f32.mrf.mxu0  ;;  %v807_v15 = vsel %vm459_vm5, %v806_v13, -inf }
 0x4e9   : > { %808 = vmax.xlane.f32.xlu0 %v807_v15 }
 0x4ea   : > { %v803_v16 = vpop.f32.mrf.mxu0 }
 0x4ec   : > { %v2022_v17 = vpop.f32.mrf.mxu0 }
 0x572   : > { %v809_v19 = vpop.xlane.xlu0 %808 }
 0x573   : > { %v810_v20 = vmax.f32 %v2724_v41, %v809_v19 }
 0x575   : > { %v813_v21 = vsub.f32 %v806_v13, %v810_v20  ;;  %v811_v25 = vsub.f32 %v2724_v41, %v810_v20  ;;  %v3137_v41 = vmov 0.0  }
 0x577   : > { %2450 = vpow2.f32 %v813_v21 }
 0x578   : > { %2452 = vpow2.f32 %v811_v25 }
 0x584   : > { %v2451_v22 = vpop.eup %2450 }
 0x585   : > { %v816_v23 = vsel %vm459_vm5, %v2451_v22, 0.0  ;;  %v820_v24 = vpack.c.bf16 %v2451_v22, %v2451_v22  ;;  %v2453_v26 = vpop.eup %2452 }
 0x586   : > { %817 = vadd.xlane.f32.xlu0 %v816_v23  ;;  %v815_v28 = vmul.f32 %v2720_v40, %v2453_v26  ;;  %v868_v30 = vmul.f32 %v2716_v38, %v2453_v26  ;;  %v3139_v40 = vmov -inf  }
 0x587   : > { %2026 = vmatmul.mubr.msk.bf16.vlgmr.msra.gmra.mxu1 %vm459_vm5, %v820_v24 }
 0x60f   : > { %v818_v27 = vpop.xlane.xlu0 %817 }
 0x610   : > { %v819_v29 = vadd.f32 %v818_v27, %v815_v28 }
 0x612   : > { %2454 = vrcp.f32 %v819_v29 }
 0x61f   : > { %v2455_v34 = vpop.eup %2454 }
 0x647   : > { %v862_v32 = vpop.f32.mrf.mxu1 }
 0x648   : > { %v869_v33 = vadd.f32 %v868_v30, %v862_v32 }
 0x649   : > { %v2027_v35 = vpop.f32.mrf.mxu1  ;;  %1797 = sbr.rel (%p1893_p0) target bundleno = 2282 (0x8ea), region = 125 }
 0x64a   : > { %v3131_v36 = vmul.f32 %v2455_v34, %v869_v33 }
 0x64b   : > { %v865_v42 = vpop.f32.mrf.mxu1 }
 0x64c   : > { %v872_v43 = vpack.c.bf16 %v3131_v36, %v3131_v36 }
 0x64d   : > { %v2028_v44 = vpop.f32.mrf.mxu1 }
 0x64e   : > { %v3143_v38 = vmov 0.0   ;;  %v3145_v46 = vmov 0.0   ;;  %v2734_v47 = vmov -inf  }
 0x64f LB: >> { %s2822_s13 = smov 120   ;;  %v2823_v48 = vmov 0.0   ;;  %s1902_s2 = sshll.u32 %s2740_s12, 3  ;;  %vm2824_vm14 = vmmov 0   ;;  %s2740_s12 = sphi %s3147_s12, %s876_s12   ;;  %v2736_v47 = vphi %v2734_v47, %v2735_v47   ;;  %v2732_v46 = vphi %v3145_v46, %v3456_v46   ;;  %v2728_v38 = vphi %v3143_v38, %v3455_v38  }
 0x650   : >> { %892 = vrot.lane.b32.xlu0 %v3070_v37, %s2822_s13  ;;  %2029 = vmatprep.subr.bf16.mxu0 %v2823_v48  ;;  %s883_s9 = sshra.s32 %s1902_s2, 3  ;;  %s876_s12 = sadd.s32 1, %s2740_s12  }
 0x651   : >> { %2031 = vmatprep.mubr.msk.bf16.mxu0 %vm2824_vm14, %v2823_v48  ;;  %2035 = vmatprep.subr.bf16.mxu1 %v2823_v48  ;;  %s1903_s8 = sshll.u32 %s883_s9, 2  ;;  %p875_p2 = scmp.ge.s32.totalorder %s876_s12, %s2680_s24 }
 0x652   : >> { %2037 = vmatprep.mubr.msk.bf16.mxu1 %vm2824_vm14, %v2823_v48  ;;  %s886_s18 = scalar_lea.vmem [#allocation2], %s1903_s8  ;;  %s889_s19 = scalar_lea.vmem [#allocation3], %s1903_s8 }
 0x653   : >> { %v887_v49 = vld [vmem:[%s886_s18] sm:$0xf] }
 0x654   : >> { %v898_v50 = vsel %vm459_vm5, %v887_v49, 0  ;;  %v890_v59 = vld [vmem:[%s889_s19] sm:$0xf] }
 0x655   : >> { %2030 = vmatpush3.bf16.xpose.msra.mxu0 %v898_v50  ;;  %v958_v60 = vsel %vm824_vm13, %v890_v59, 0 }
 0x656   : >> { %2036 = vmatpush3.bf16.msra.mxu1 %v958_v60 }
 0x6c2   : >> { %v893_v51 = vpop.permute.xlu0 %892 }
 0x6c3   : >> { %2032 = vmatmul.mubr.msk.bf16.vlgmr.msra.gmra.mxu0 %vm459_vm5, %v893_v51 }
 0x783   : >> { %v934_v52 = vpop.f32.mrf.mxu0 }
 0x784   : >> { %v940_v53 = vsel %vm459_vm5, %v934_v52, -inf }
 0x785   : >> { %941 = vmax.xlane.f32.xlu0 %v940_v53  ;;  %v2033_v54 = vpop.f32.mrf.mxu0 }
 0x787   : >> { %v937_v55 = vpop.f32.mrf.mxu0 }
 0x789   : >> { %v2034_v56 = vpop.f32.mrf.mxu0 }
 0x80e   : >> { %v942_v61 = vpop.xlane.xlu0 %941 }
 0x80f   : >> { %v943_v62 = vmax.f32 %v2736_v47, %v942_v61  }
 0x811   : >> { %v944_v63 = vsub.f32 %v2736_v47, %v943_v62  ;;  %v946_v1 = vsub.f32 %v934_v52, %v943_v62  ;;  %v2735_v47 = vmov %v943_v62   ;;  %v3459_v40 = vmov (%p875_p2), %v943_v62 }
 0x813   : >> { %2456 = vpow2.f32 %v946_v1 }
 0x814   : >> { %2458 = vpow2.f32 %v944_v63 }
 0x820   : >> { %v2457_v2 = vpop.eup %2456 }
 0x821   : >> { %v949_v3 = vsel %vm459_vm5, %v2457_v2, 0.0  ;;  %v953_v4 = vpack.c.bf16 %v2457_v2, %v2457_v2  ;;  %v2459_v5 = vpop.eup %2458 }
 0x822   : >> { %950 = vadd.xlane.f32.xlu1 %v949_v3  ;;  %v948_v6 = vmul.f32 %v2732_v46, %v2459_v5  ;;  %v1000_v9 = vmul.f32 %v2728_v38, %v2459_v5 }
 0x823   : >> { %2038 = vmatmul.mubr.msk.bf16.vlgmr.msra.gmra.mxu1 %vm459_vm5, %v953_v4 }
 0x8ab   : >> { %v951_v7 = vpop.xlane.xlu1 %950 }
 0x8ac   : >> { %v952_v8 = vadd.f32 %v951_v7, %v948_v6  }
 0x8ae   : >> { %v3456_v46 = vmov %v952_v8  ;;  %v3458_v41 = vmov (%p875_p2), %v952_v8 }
 0x8e3   : >> { %v994_v10 = vpop.f32.mrf.mxu1 }
 0x8e4   : >> { %v1001_v12 = vadd.f32 %v1000_v9, %v994_v10  }
 0x8e5   : >> { %v2039_v13 = vpop.f32.mrf.mxu1  ;;  %878 = sbr.rel (!%p875_p2) target bundleno = 1615 (0x64f), region = 131 }
 0x8e6   : >> { %v3455_v38 = vmov %v1001_v12  ;;  %v3457_v45 = vmov (%p875_p2), %v1001_v12 }
 0x8e7   : >> { %v997_v14 = vpop.f32.mrf.mxu1 }
 0x8e9   : >> { %v2040_v15 = vpop.f32.mrf.mxu1 }
 0x8ea PF: > { %2041 = vmatprep.subr.bf16.mxu0 %v2810_v0  ;;  %2043 = vmatprep.mubr.msk.bf16.mxu0 %vm2811_vm0, %v2810_v0  ;;  %s2825_s20 = smov 120   ;;  %v3200_v50 = vmov 0.0   ;;  %s3214_s29 = smov (!%p1893_p0), 0   ;;  %v2752_v40 = vphi %v3139_v40, %v3459_v40   ;;  %v2748_v41 = vphi %v3137_v41, %v3458_v41   ;;  %v2744_v45 = vphi %v3135_v45, %v3457_v45  }
 0x8eb   : > { %1003 = vrot.lane.b32.xlu0 %v3070_v37, %s2825_s20  ;;  %2042 = vmatpush3.bf16.xpose.msra.mxu0 %v3110_v11 }
 0x8ec   : > { %2047 = vmatprep.subr.bf16.mxu1 %v2810_v0  ;;  %2049 = vmatprep.mubr.msk.bf16.mxu1 %vm2811_vm0, %v2810_v0 }
 0x8ed   : > { %2048 = vmatpush3.bf16.msra.mxu1 %v3126_v18 }
 0x95d   : > { %v1004_v16 = vpop.permute.xlu0 %1003 }
 0x95e   : > { %2044 = vmatmul.mubr.msk.bf16.vlgmr.msra.gmra.mxu0 %vm459_vm5, %v1004_v16 }
 0xa1e   : > { %v1042_v17 = vpop.f32.mrf.mxu0 }
 0xa1f   : > { %v1048_v19 = vsel %vm632_vm3, %v1042_v17, -inf }
 0xa20   : > { %v2045_v20 = vpop.f32.mrf.mxu0  ;;  %v1049_v21 = vsel %vm459_vm5, %v1048_v19, -inf }
 0xa21   : > { %1050 = vmax.xlane.f32.xlu0 %v1049_v21 }
 0xa22   : > { %v1045_v11 = vpop.f32.mrf.mxu0 }
 0xa24   : > { %v2046_v22 = vpop.f32.mrf.mxu0 }
 0xaaa   : > { %v1051_v23 = vpop.xlane.xlu0 %1050 }
 0xaab   : > { %v1052_v24 = vmax.f32 %v2752_v40, %v1051_v23 }
 0xaad   : > { %v1055_v25 = vsub.f32 %v1048_v19, %v1052_v24  ;;  %v1053_v28 = vsub.f32 %v2752_v40, %v1052_v24  ;;  %v3202_v40 = vmov 0.0  }
 0xaaf   : > { %2460 = vpow2.f32 %v1055_v25 }
 0xab0   : > { %2462 = vpow2.f32 %v1053_v28 }
 0xabc   : > { %v2461_v26 = vpop.eup %2460 }
 0xabd   : > { %v1058_v18 = vsel %vm459_vm5, %v2461_v26, 0.0  ;;  %v1062_v27 = vpack.c.bf16 %v2461_v26, %v2461_v26  ;;  %v2463_v29 = vpop.eup %2462 }
 0xabe   : > { %1059 = vadd.xlane.f32.xlu1 %v1058_v18  ;;  %v1057_v32 = vmul.f32 %v2748_v41, %v2463_v29  ;;  %v1106_v34 = vmul.f32 %v2744_v45, %v2463_v29  ;;  %v3204_v41 = vmov -inf  }
 0xabf   : > { %2050 = vmatmul.mubr.msk.bf16.vlgmr.msra.gmra.mxu1 %vm459_vm5, %v1062_v27 }
 0xb47   : > { %v1060_v30 = vpop.xlane.xlu1 %1059 }
 0xb48   : > { %v1061_v33 = vadd.f32 %v1060_v30, %v1057_v32 }
 0xb4a   : > { %2464 = vrcp.f32 %v1061_v33 }
 0xb57   : > { %v2465_v44 = vpop.eup %2464 }
 0xb7f   : > { %v1100_v35 = vpop.f32.mrf.mxu1 }
 0xb80   : > { %v1107_v42 = vadd.f32 %v1106_v34, %v1100_v35 }
 0xb81   : > { %v2051_v38 = vpop.f32.mrf.mxu1  ;;  %1811 = sbr.rel (%p1893_p0) target bundleno = 3630 (0xe2e), region = 136 }
 0xb82   : > { %v3196_v46 = vmul.f32 %v2465_v44, %v1107_v42 }
 0xb83   : > { %v1103_v47 = vpop.f32.mrf.mxu1 }
 0xb84   : > { %v1110_v48 = vpack.c.bf16 %v3196_v46, %v3196_v46 }
 0xb85   : > { %v2052_v49 = vpop.f32.mrf.mxu1 }
 0xb86   : > { %v3208_v45 = vmov 0.0   ;;  %v3210_v51 = vmov 0.0   ;;  %v3212_v52 = vmov -inf  }
 0xb87 LB: >> { %v2826_v53 = vmov 0.0   ;;  %vm2827_vm15 = vmmov 0   ;;  %s1910_s30 = sshll.u32 %s2768_s29, 3  ;;  %s2828_s8 = smov 120   ;;  %s2768_s29 = sphi %s3214_s29, %s1114_s29   ;;  %v2764_v52 = vphi %v3212_v52, %v3462_v52   ;;  %v2760_v51 = vphi %v3210_v51, %v3461_v51   ;;  %v2756_v45 = vphi %v3208_v45, %v3460_v45  }
 0xb88   : >> { %2053 = vmatprep.subr.bf16.mxu0 %v2826_v53  ;;  %2055 = vmatprep.mubr.msk.bf16.mxu0 %vm2827_vm15, %v2826_v53  ;;  %s1121_s12 = sshra.s32 %s1910_s30, 3  ;;  %s2829_s18 = smov 112  }
 0xb89   : >> { %2059 = vmatprep.subr.bf16.mxu1 %v2826_v53  ;;  %2061 = vmatprep.mubr.msk.bf16.mxu1 %vm2827_vm15, %v2826_v53  ;;  %s1911_s13 = sshll.u32 %s1121_s12, 2  ;;  %s1114_s29 = sadd.s32 1, %s2768_s29  }
 0xb8a   : >> { %s1124_s2 = scalar_lea.vmem [#allocation2], %s1911_s13  ;;  %s1127_s9 = scalar_lea.vmem [#allocation3], %s1911_s13 }
 0xb8b   : >> { %v2466_v54 = vld [vmem:[%s1124_s2] ss:$0 sps:$4 sm:$0xff]   ;;  %p1113_p4 = scmp.ge.s32.totalorder %s1114_s29, %s2680_s24 }
 0xb8c   : >> { %1134 = vrot.lane.b32.xlu0 %v2466_v54, %s2828_s8  ;;  %v2467_v2 = vld [vmem:[%s1127_s9] ss:$0 sps:$4 sm:$0xff]  }
 0xb90   : >> { %1129 = vrot.lane.b32.xlu0 %v3070_v37, %s2829_s18 }
 0xbfe   : >> { %v1135_v55 = vpop.permute.xlu0 %1134 }
 0xbff   : >> { %v1140_v56 = vsel %vm459_vm5, %v1135_v55, 0 }
 0xc00   : >> { %2054 = vmatpush3.bf16.xpose.msra.mxu0 %v1140_v56 }
 0xc02   : >> { %v1130_v59 = vpop.permute.xlu0 %1129 }
 0xc07   : >> { %2056 = vmatmul.mubr.msk.bf16.vlgmr.msra.gmra.mxu0 %vm459_vm5, %v1130_v59 }
 0xcc7   : >> { %v1176_v60 = vpop.f32.mrf.mxu0 }
 0xcc8   : >> { %v1182_v61 = vsel %vm459_vm5, %v1176_v60, -inf }
 0xcc9   : >> { %1183 = vmax.xlane.f32.xlu1 %v1182_v61  ;;  %v2057_v62 = vpop.f32.mrf.mxu0 }
 0xccb   : >> { %v1179_v63 = vpop.f32.mrf.mxu0 }
 0xccd   : >> { %v2058_v1 = vpop.f32.mrf.mxu0 }
 0xcda   : >> { %1199 = vrot.lane.b32.xlu1 %v2467_v2, %s2828_s8 }
 0xd52   : >> { %v1184_v3 = vpop.xlane.xlu1 %1183 }
 0xd53   : >> { %v1185_v4 = vmax.f32 %v2764_v52, %v1184_v3  }
 0xd55   : >> { %v1186_v5 = vsub.f32 %v2764_v52, %v1185_v4  ;;  %v1188_v6 = vsub.f32 %v1176_v60, %v1185_v4  ;;  %v3462_v52 = vmov %v1185_v4  ;;  %v3465_v41 = vmov (%p1113_p4), %v1185_v4 }
 0xd56   : >> { %v1200_v7 = vpop.permute.xlu1 %1199 }
 0xd57   : >> { %v1205_v8 = vsel %vm824_vm13, %v1200_v7, 0  ;;  %2468 = vpow2.f32 %v1188_v6 }
 0xd58   : >> { %2060 = vmatpush3.bf16.msra.mxu1 %v1205_v8  ;;  %2470 = vpow2.f32 %v1186_v5 }
 0xd64   : >> { %v2469_v9 = vpop.eup %2468 }
 0xd65   : >> { %v1191_v10 = vsel %vm459_vm5, %v2469_v9, 0.0  ;;  %v1195_v12 = vpack.c.bf16 %v2469_v9, %v2469_v9  ;;  %v2471_v13 = vpop.eup %2470 }
 0xd66   : >> { %1192 = vadd.xlane.f32.xlu0 %v1191_v10  ;;  %v1190_v14 = vmul.f32 %v2760_v51, %v2471_v13  ;;  %v1247_v17 = vmul.f32 %v2756_v45, %v2471_v13 }
 0xd67   : >> { %2062 = vmatmul.mubr.msk.bf16.vlgmr.msra.gmra.mxu1 %vm459_vm5, %v1195_v12 }
 0xdef   : >> { %v1193_v15 = vpop.xlane.xlu0 %1192 }
 0xdf0   : >> { %v1194_v16 = vadd.f32 %v1193_v15, %v1190_v14  }
 0xdf2   : >> { %v3461_v51 = vmov %v1194_v16  ;;  %v3464_v40 = vmov (%p1113_p4), %v1194_v16 }
 0xe27   : >> { %v1241_v19 = vpop.f32.mrf.mxu1 }
 0xe28   : >> { %v1248_v20 = vadd.f32 %v1247_v17, %v1241_v19  }
 0xe29   : >> { %v2063_v21 = vpop.f32.mrf.mxu1  ;;  %1116 = sbr.rel (!%p1113_p4) target bundleno = 2951 (0xb87), region = 142 }
 0xe2a   : >> { %v3460_v45 = vmov %v1248_v20  ;;  %v3463_v50 = vmov (%p1113_p4), %v1248_v20 }
 0xe2b   : >> { %v1244_v11 = vpop.f32.mrf.mxu1 }
 0xe2d   : >> { %v2064_v22 = vpop.f32.mrf.mxu1 }
 0xe2e PF: > { %1252 = vrot.lane.b32.xlu0 %v3062_v31, %s2825_s20  ;;  %2065 = vmatprep.subr.bf16.mxu0 %v2810_v0  ;;  %s2830_s19 = smov 112   ;;  %v3279_v63 = vmov 0.0   ;;  %v2780_v41 = vphi %v3204_v41, %v3465_v41   ;;  %v2776_v40 = vphi %v3202_v40, %v3464_v40   ;;  %v2772_v50 = vphi %v3200_v50, %v3463_v50  }
 0xe2f   : > { %2067 = vmatprep.mubr.msk.bf16.mxu0 %vm2811_vm0, %v2810_v0  ;;  %2071 = vmatprep.subr.bf16.mxu1 %v2810_v0 }
 0xe30   : > { %2073 = vmatprep.mubr.msk.bf16.mxu1 %vm2811_vm0, %v2810_v0 }
 0xe32   : > { %1249 = vrot.lane.b32.xlu0 %v3070_v37, %s2830_s19 }
 0xea0   : > { %v1253_v23 = vpop.permute.xlu0 %1252 }
 0xea1   : > { %v3259_v24 = vsel %vm459_vm5, %v1253_v23, 0 }
 0xea2   : > { %2066 = vmatpush3.bf16.xpose.msra.mxu0 %v3259_v24 }
 0xea4   : > { %v1250_v31 = vpop.permute.xlu0 %1249 }
 0xea9   : > { %2068 = vmatmul.mubr.msk.bf16.vlgmr.msra.gmra.mxu0 %vm459_vm5, %v1250_v31 }
 0xf69   : > { %v1294_v25 = vpop.f32.mrf.mxu0 }
 0xf6a   : > { %v1300_v26 = vsel %vm632_vm3, %v1294_v25, -inf }
 0xf6b   : > { %v2069_v18 = vpop.f32.mrf.mxu0  ;;  %v1301_v27 = vsel %vm459_vm5, %v1300_v26, -inf }
 0xf6c   : > { %1302 = vmax.xlane.f32.xlu1 %v1301_v27 }
 0xf6d   : > { %v1297_v28 = vpop.f32.mrf.mxu0 }
 0xf6f   : > { %v2070_v29 = vpop.f32.mrf.mxu0 }
 0xf7d   : > { %1316 = vrot.lane.b32.xlu1 %v3033_v39, %s2825_s20  ;;  %s3293_s20 = smov (!%p1893_p0), 0  }
 0xff5   : > { %v1303_v30 = vpop.xlane.xlu1 %1302 }
 0xff6   : > { %v1304_v32 = vmax.f32 %v2780_v41, %v1303_v30 }
 0xff8   : > { %v1307_v33 = vsub.f32 %v1300_v26, %v1304_v32  ;;  %v1305_v47 = vsub.f32 %v2780_v41, %v1304_v32  ;;  %v3281_v41 = vmov 0.0  }
 0xff9   : > { %v1317_v34 = vpop.permute.xlu1 %1316 }
 0xffa   : > { %v3270_v35 = vsel %vm824_vm13, %v1317_v34, 0  ;;  %2472 = vpow2.f32 %v1307_v33 }
 0xffb   : > { %2072 = vmatpush3.bf16.msra.mxu1 %v3270_v35  ;;  %2474 = vpow2.f32 %v1305_v47 }
0x1007   : > { %v2473_v42 = vpop.eup %2472 }
0x1008   : > { %v1310_v44 = vsel %vm459_vm5, %v2473_v42, 0.0  ;;  %v1314_v38 = vpack.c.bf16 %v2473_v42, %v2473_v42  ;;  %v2475_v39 = vpop.eup %2474 }
0x1009   : > { %1311 = vadd.xlane.f32.xlu0 %v1310_v44  ;;  %v1309_v45 = vmul.f32 %v2776_v40, %v2475_v39  ;;  %v1364_v52 = vmul.f32 %v2772_v50, %v2475_v39  ;;  %v3283_v40 = vmov -inf  }
0x100a   : > { %2074 = vmatmul.mubr.msk.bf16.vlgmr.msra.gmra.mxu1 %vm459_vm5, %v1314_v38 }
0x1092   : > { %v1312_v49 = vpop.xlane.xlu0 %1311 }
0x1093   : > { %v1313_v51 = vadd.f32 %v1312_v49, %v1309_v45 }
0x1095   : > { %2476 = vrcp.f32 %v1313_v51 }
0x10a2   : > { %v2477_v55 = vpop.eup %2476 }
0x10ca   : > { %v1358_v53 = vpop.f32.mrf.mxu1 }
0x10cb   : > { %v1365_v54 = vadd.f32 %v1364_v52, %v1358_v53 }
0x10cc   : > { %v2075_v56 = vpop.f32.mrf.mxu1  ;;  %1825 = sbr.rel (%p1893_p0) target bundleno = 4985 (0x1379), region = 147 }
0x10cd   : > { %v3275_v59 = vmul.f32 %v2477_v55, %v1365_v54 }
0x10ce   : > { %v1361_v60 = vpop.f32.mrf.mxu1 }
0x10cf   : > { %v1368_v61 = vpack.c.bf16 %v3275_v59, %v3275_v59 }
0x10d0   : > { %v2076_v62 = vpop.f32.mrf.mxu1 }
0x10d1   : > { %v3287_v50 = vmov 0.0   ;;  %v3289_v1 = vmov 0.0   ;;  %v3291_v2 = vmov -inf  }
0x10d2 LB: >> { %v2831_v3 = vmov 0.0   ;;  %vm2832_vm2 = vmmov 0   ;;  %s1920_s29 = sshll.u32 %s2796_s20, 3  ;;  %s2833_s9 = smov 120   ;;  %s2796_s20 = sphi %s3293_s20, %s1372_s20   ;;  %v2792_v2 = vphi %v3291_v2, %v3468_v2   ;;  %v2788_v1 = vphi %v3289_v1, %v3467_v1   ;;  %v2784_v50 = vphi %v3287_v50, %v3466_v50  }
0x10d3   : >> { %2077 = vmatprep.subr.bf16.mxu0 %v2831_v3  ;;  %2079 = vmatprep.mubr.msk.bf16.mxu0 %vm2832_vm2, %v2831_v3  ;;  %s1379_s30 = sshra.s32 %s1920_s29, 3  ;;  %s2834_s8 = smov 104  }
0x10d4   : >> { %2083 = vmatprep.subr.bf16.mxu1 %v2831_v3  ;;  %2085 = vmatprep.mubr.msk.bf16.mxu1 %vm2832_vm2, %v2831_v3  ;;  %s1921_s12 = sshll.u32 %s1379_s30, 2  ;;  %s1372_s20 = sadd.s32 1, %s2796_s20  }
0x10d5   : >> { %s1382_s13 = scalar_lea.vmem [#allocation2], %s1921_s12  ;;  %s1385_s2 = scalar_lea.vmem [#allocation3], %s1921_s12 }
0x10d6   : >> { %v2478_v4 = vld [vmem:[%s1382_s13] ss:$0 sps:$4 sm:$0xff]   ;;  %p1371_p5 = scmp.ge.s32.totalorder %s1372_s20, %s2680_s24 }
0x10d7   : >> { %1392 = vrot.lane.b32.xlu0 %v2478_v4, %s2833_s9  ;;  %v2479_v14 = vld [vmem:[%s1385_s2] ss:$0 sps:$4 sm:$0xff]  }
0x10db   : >> { %1387 = vrot.lane.b32.xlu0 %v3070_v37, %s2834_s8 }
0x1149   : >> { %v1393_v5 = vpop.permute.xlu0 %1392 }
0x114a   : >> { %v1398_v6 = vsel %vm459_vm5, %v1393_v5, 0 }
0x114b   : >> { %2078 = vmatpush3.bf16.xpose.msra.mxu0 %v1398_v6 }
0x114d   : >> { %v1388_v7 = vpop.permute.xlu0 %1387 }
0x1152   : >> { %2080 = vmatmul.mubr.msk.bf16.vlgmr.msra.gmra.mxu0 %vm459_vm5, %v1388_v7 }
0x1212   : >> { %v1434_v8 = vpop.f32.mrf.mxu0 }
0x1213   : >> { %v1440_v9 = vsel %vm459_vm5, %v1434_v8, -inf }
0x1214   : >> { %1441 = vmax.xlane.f32.xlu1 %v1440_v9  ;;  %v2081_v10 = vpop.f32.mrf.mxu0 }
0x1216   : >> { %v1437_v12 = vpop.f32.mrf.mxu0 }
0x1218   : >> { %v2082_v13 = vpop.f32.mrf.mxu0 }
0x1225   : >> { %1457 = vrot.lane.b32.xlu1 %v2479_v14, %s2833_s9 }
0x129d   : >> { %v1442_v15 = vpop.xlane.xlu1 %1441 }
0x129e   : >> { %v1443_v16 = vmax.f32 %v2792_v2, %v1442_v15  }
0x12a0   : >> { %v1444_v17 = vsub.f32 %v2792_v2, %v1443_v16  ;;  %v1446_v19 = vsub.f32 %v1434_v8, %v1443_v16  ;;  %v3468_v2 = vmov %v1443_v16  ;;  %v3471_v40 = vmov (%p1371_p5), %v1443_v16 }
0x12a1   : >> { %v1458_v20 = vpop.permute.xlu1 %1457 }
0x12a2   : >> { %v1463_v21 = vsel %vm824_vm13, %v1458_v20, 0  ;;  %2480 = vpow2.f32 %v1446_v19 }
0x12a3   : >> { %2084 = vmatpush3.bf16.msra.mxu1 %v1463_v21  ;;  %2482 = vpow2.f32 %v1444_v17 }
0x12af   : >> { %v2481_v11 = vpop.eup %2480 }
0x12b0   : >> { %v1449_v22 = vsel %vm459_vm5, %v2481_v11, 0.0  ;;  %v1453_v23 = vpack.c.bf16 %v2481_v11, %v2481_v11  ;;  %v2483_v31 = vpop.eup %2482 }
0x12b1   : >> { %1450 = vadd.xlane.f32.xlu0 %v1449_v22  ;;  %v1448_v25 = vmul.f32 %v2788_v1, %v2483_v31  ;;  %v1505_v27 = vmul.f32 %v2784_v50, %v2483_v31 }
0x12b2   : >> { %2086 = vmatmul.mubr.msk.bf16.vlgmr.msra.gmra.mxu1 %vm459_vm5, %v1453_v23 }
0x133a   : >> { %v1451_v26 = vpop.xlane.xlu0 %1450 }
0x133b   : >> { %v1452_v18 = vadd.f32 %v1451_v26, %v1448_v25  }
0x133d   : >> { %v3467_v1 = vmov %v1452_v18  ;;  %v3470_v41 = vmov (%p1371_p5), %v1452_v18 }
0x1372   : >> { %v1499_v28 = vpop.f32.mrf.mxu1 }
0x1373   : >> { %v1506_v29 = vadd.f32 %v1505_v27, %v1499_v28  }
0x1374   : >> { %v2087_v30 = vpop.f32.mrf.mxu1  ;;  %1374 = sbr.rel (!%p1371_p5) target bundleno = 4306 (0x10d2), region = 153 }
0x1375   : >> { %v3466_v50 = vmov %v1506_v29  ;;  %v3469_v63 = vmov (%p1371_p5), %v1506_v29 }
0x1376   : >> { %v1502_v32 = vpop.f32.mrf.mxu1 }
0x1378   : >> { %v2088_v33 = vpop.f32.mrf.mxu1 }
0x1379 PF: > { %2089 = vmatprep.subr.bf16.mxu0 %v2810_v0  ;;  %2091 = vmatprep.mubr.msk.bf16.mxu0 %vm2811_vm0, %v2810_v0  ;;  %s2835_s18 = smov 104   ;;  %v2484_v57 = vld [vmem:[%s3438_s4 + $0x8] sm:$0xff]   ;;  %v2485_v58 = vld [vmem:[%s3438_s4] sm:$0xff]   ;;  %v2808_v40 = vphi %v3283_v40, %v3471_v40   ;;  %v2804_v41 = vphi %v3281_v41, %v3470_v41   ;;  %v2800_v63 = vphi %v3279_v63, %v3469_v63  }
0x137a   : > { %1507 = vrot.lane.b32.xlu0 %v3070_v37, %s2835_s18  ;;  %2090 = vmatpush3.bf16.xpose.msra.mxu0 %v3259_v24  ;;  %s2836_s18 = smov [#allocation4]  }
0x137b   : > { %2095 = vmatprep.subr.bf16.mxu1 %v2810_v0  ;;  %2097 = vmatprep.mubr.msk.bf16.mxu1 %vm2811_vm0, %v2810_v0  ;;  %s2496_s19 = sshll.u32 %s2836_s18, 4  ;;  %s2497_s19 = int_to_ptr.vmem [resolvable:$false] %s2496_s19 }
0x137c   : > { %2096 = vmatpush3.bf16.msra.mxu1 %v3270_v35  ;;  %s2498_s20 = scalar_lea.vmem %s2497_s19, 256 }
0x137d   : > { %2101 = vmatprep.subr.bf16.mxu1 %v2810_v0 }
0x13ec   : > { %v1508_v34 = vpop.permute.xlu0 %1507 }
0x13ed   : > { %2092 = vmatmul.mubr.msk.bf16.vlgmr.msra.gmra.mxu0 %vm459_vm5, %v1508_v34 }
0x14ad   : > { %v1546_v42 = vpop.f32.mrf.mxu0 }
0x14ae   : > { %v1552_v44 = vsel %vm632_vm3, %v1546_v42, -inf }
0x14af   : > { %v2093_v37 = vpop.f32.mrf.mxu0  ;;  %v1553_v24 = vsel %vm459_vm5, %v1552_v44, -inf }
0x14b0   : > { %1554 = vmax.xlane.f32.xlu0 %v1553_v24 }
0x14b1   : > { %v1549_v38 = vpop.f32.mrf.mxu0 }
0x14b3   : > { %v2094_v47 = vpop.f32.mrf.mxu0 }
0x1539   : > { %v1555_v39 = vpop.xlane.xlu0 %1554 }
0x153a   : > { %v1556_v49 = vmax.f32 %v2808_v40, %v1555_v39 }
0x153c   : > { %v1559_v45 = vsub.f32 %v1552_v44, %v1556_v49  ;;  %v1557_v53 = vsub.f32 %v2808_v40, %v1556_v49 }
0x153e   : > { %2486 = vpow2.f32 %v1559_v45 }
0x153f   : > { %2488 = vpow2.f32 %v1557_v53 }
0x154b   : > { %v2487_v35 = vpop.eup %2486 }
0x154c   : > { %v1562_v51 = vsel %vm459_vm5, %v2487_v35, 0.0  ;;  %v1566_v52 = vpack.c.bf16 %v2487_v35, %v2487_v35  ;;  %v2489_v46 = vpop.eup %2488 }
0x154d   : > { %1563 = vadd.xlane.f32.xlu1 %v1562_v51  ;;  %v1561_v54 = vmul.f32 %v2804_v41, %v2489_v46  ;;  %v1610_v56 = vmul.f32 %v2800_v63, %v2489_v46 }
0x154e   : > { %2098 = vmatmul.mubr.msk.bf16.vlgmr.msra.gmra.mxu1 %vm459_vm5, %v1566_v52 }
0x154f   : > { %2105 = vmatprep.mubr.msk.bf16.mxu1 %vm2811_vm0, %v2810_v0  ;;  %2102 = vmatpush3.bf16.msra.mxu1 %v2484_v57 }
0x1550   : > { %2103 = vmatprep.subr.bf16.mxu1 %v2810_v0 }
0x1553   : > { %2104 = vmatpush3.bf16.msra.mxu1 %v2485_v58 }
0x155e   : > { %1616 = vrot.lane.b32.xlu1 %v1110_v48, %s2816_s7  ;;  %s1933_s7 = sshll.u32 %s2684_s25, 1  ;;  %s3472_s25 = sand.u32 1, %s2672_s22  }
0x1562   : > { %1619 = vrot.lane.b32.xlu1 %v1368_v61, %s2818_s16  ;;  %s1702_s16 = sadd.s32 %s2680_s24, %s1933_s7  ;;  %s1691_s24 = scalar_lea.sflag [#allocation5], %s3472_s25 }
0x1563   : > { %s1934_s12 = sshll.u32 %s1702_s16, 7 }
0x1564   : > { %s3377_s9 = scalar_lea.hbm %s3440_s6, %s1934_s12 }
0x15d6   : > { %v1564_v48 = vpop.xlane.xlu1 %1563 }
0x15d7   : > { %v1565_v55 = vadd.f32 %v1564_v48, %v1561_v54 }
0x15d9   : > { %2490 = vrcp.f32 %v1565_v55 }
0x15da   : > { %v1617_v40 = vpop.permute.xlu1 %1616 }
0x15db   : > { %v1626_v63 = vsel %vm459_vm5, %v872_v43, %v1617_v40 }
0x15de   : > { %v1620_v41 = vpop.permute.xlu1 %1619 }
0x15df   : > { %v1628_v3 = vsel %vm619_vm7, %v1626_v63, %v1620_v41 }
0x15e6   : > { %v2491_v61 = vpop.eup %2490 }
0x160e   : > { %v1604_v59 = vpop.f32.mrf.mxu1 }
0x160f   : > { %v1611_v60 = vadd.f32 %v1610_v56, %v1604_v59 }
0x1610   : > { %v2099_v62 = vpop.f32.mrf.mxu1 }
0x1611   : > { %v1613_v50 = vmul.f32 %v2491_v61, %v1611_v60 }
0x1612   : > { %v1607_v1 = vpop.f32.mrf.mxu1 }
0x1613   : > { %v1614_v2 = vpack.c.bf16 %v1613_v50, %v1613_v50 }
0x1614   : > { %v2100_v0 = vpop.f32.mrf.mxu1 }
0x1615   : > { %1622 = vrot.lane.b32.xlu1 %v1614_v2, %s2819_s14  ;;  %s1706_s14 = sshll.u32 %s279_s27, 4  ;;  %s3379_s14 = int_to_ptr.vmem [resolvable:$true] %s1706_s14 }
0x1616   : > { %s2492_s8 = scalar_lea.vmem %s3379_s14, 128  ;;  %p2499_p10 = scmp.lt.s32.totalorder %s3379_s14, %s2497_s19 }
0x1617   : > { %p2493_p6 = scmp.ne.s32.totalorder %s3379_s14, %s2492_s8  ;;  %p2500_p11 = scmp.lt.s32.totalorder %s2498_s20, %s2492_s8 }
0x1619   : > { %p2494_p7 = pnand %p2493_p6, %p2923_p3  ;;  %p2501_p12 = por %p2500_p11, %p2499_p10 }
0x161b   : > { %p2495_p9 = pneg %p2494_p7 }
0x161d   : > { %p2502_p13 = pnand %p2501_p12, %p2495_p9 }
0x1687   : > { %v1623_v4 = vpop.permute.xlu1 %1622 }
0x1688   : > { %v1630_v5 = vsel %vm623_vm9, %v1628_v3, %v1623_v4 }
0x1689   : > { %2106 = vmatmul.mubr.msk.bf16.vlgmr.msra.gmra.mxu1 %vm311_vm1, %v1630_v5 }
0x1749   : > { %v1683_v36 = vpop.f32.mrf.mxu1 }
0x174a   : > { %1689 = vst.msk [vmem:[%s279_s27] sm:$0xff] %vm311_vm1, %v1683_v36 }
0x174b   : > { %v2107_v43 = vpop.f32.mrf.mxu1 }
0x174c   : > { %2505 = shalt.err (!%p2502_p13)
}
0x174d   : > { %s2506_s17 = scalar_lea.hbm %s3377_s9, 128  ;;  %s2510_s30 = scalar_lea.hbm %s3440_s6, 512 }
0x174e   : > { %p2507_p0 = scmp.ne.s32.totalorder %s3377_s9, %s2506_s17  ;;  %p2511_p4 = scmp.lt.s32.totalorder %s3377_s9, %s3440_s6 }
0x174f   : > { %p2512_p5 = scmp.lt.s32.totalorder %s2510_s30, %s2506_s17 }
0x1750   : > { %p2508_p1 = pnand %p2507_p0, %p2923_p3 }
0x1751   : > { %p2513_p6 = por %p2512_p5, %p2511_p4 }
0x1752   : > { %p2509_p2 = pneg %p2508_p1 }
0x1754   : > { %p2514_p7 = pnand %p2513_p6, %p2509_p2 }
0x1756   : > { %2517 = shalt.err (!%p2514_p7)
}
0x1757   : > { %2109 = dma.vmem_to_hbm [thread:$0]  (%p2923_p3), %s3379_s14, 128, %s3377_s9, %s1691_s24   ;;  %v1686_v6 = vpop.f32.mrf.mxu1 }
0x1759   : > { %v2108_v7 = vpop.f32.mrf.mxu1 }
0x175a PF: > { %p2115_p9 = scmp.ge.s32.totalorder %s2696_s28, 2  ;;  %s1718_s12 = sand.u32 1, %s2668_s21  }
0x175b   : > { %s1719_s13 = scalar_lea.sflag [#allocation5], %s1718_s12 }
0x175c   : > { %p2112_p10 = pnand %p2115_p9, %p2932_p8 }
0x175e   : > { %p2113_p11 = pneg %p2112_p10 }
0x1760   : > { %2663 = dma.done.wait (%p2113_p11), %s1719_s13, 128  }
0x1761   : > { %2665 = vsyncadd (%p2113_p11), %s1719_s13, 4294967168  ;;  %s19_s28 = sadd.s32 1, %s2696_s28   ;;  %s3473_s25 = sld [smem:[#allocation7_spill]] }
0x1762   : > { %p16_p12 = scmp.ge.s32.totalorder %s19_s28, 6   ;;  %s3474_s10 = sld [smem:[#allocation8_spill]] }
0x1763   : > { %s3475_s27 = sld [smem:[#allocation9_spill]]  ;;  %s3476_s21 = smov %s2672_s22 }
0x1764   : > { %s3477_s22 = smov %s2676_s23  ;;  %s3478_s23 = smov %s2941_s15 }
0x1765   : > { %s3479_s24 = smov %s2688_s26  ;;  %18 = sbr.rel (!%p16_p12) target bundleno = 7 (0x7), region = 164 }
0x1768   : > { %s3480_s26 = smov %s3474_s10 }
0x176a   :  { %1724 = vsyncpa [#allocation5], 1 }
0x176b   :  { %1726 = vsyncpa [#allocation5 + $0x1], 1 }

</bundles_post_ra>
